<compile_context>
chip_gen: v5e
topology: v5e:2x2
jax: 0.10.0
libtpu: 0.0.40
codegen_flags: <defaults>
</compile_context>

<pallas_src>
import functools

import numpy as np
import jax
import jax.numpy as jnp
from jax.experimental import pallas as pl
from jax.experimental.pallas import tpu as pltpu


# ----------------------------------------------------------------------------
# Fused Pallas kernel: whole dense block for one batch element
# ----------------------------------------------------------------------------
def _denseblock_kernel(x_ref, w_ref, scale_ref, bias_ref, mask_ref, o_ref,
                       col_ref, *, H, W, C0, k, L):
    # x_ref:     (1, C0, H*W)      input image, channel-major, spatial flattened
    # w_ref:     (L, k, 9*Ct)      per-layer weights, K laid out as tap*Ct + ch
    # scale_ref: (L, k, 1)         BN gamma / sqrt(var + eps)
    # bias_ref:  (L, k, 1)         BN beta + (conv_bias - mean) * scale
    # mask_ref:  (9, 1, H*W)       0/1 validity mask per 3x3 tap (conv zero pad)
    # o_ref:     (1, L*k, H*W)     all layer features, channel-major (lane-dense)
    # col_ref:   (9*Ct, H*W) VMEM  shared im2col matrix, grows channel-wise
    HW = H * W
    Ct = C0 + (L - 1) * k

    # Channels not yet produced must read as exact zeros: their weights are
    # zero too, but uninitialized VMEM could hold NaN/Inf (0 * NaN = NaN).
    col_ref[...] = jnp.zeros_like(col_ref)

    def rotate_lanes(a, s):
        # b[:, p] = a[:, (p + s) % HW]   (explicit slice+concat: fixed semantics)
        s = s % HW
        if s == 0:
            return a
        return jnp.concatenate([a[:, s:], a[:, :s]], axis=1)

    def scatter_taps(feat, ch_off, c):
        # Write the 9 shifted + boundary-masked copies of `feat` (c, HW) into
        # the im2col scratch at channel offset `ch_off`.
        for dy in range(3):
            for dx in range(3):
                t = dy * 3 + dx
                off = (dy - 1) * W + (dx - 1)
                tap = rotate_lanes(feat, off) * mask_ref[t]
                col_ref[t * Ct + ch_off:t * Ct + ch_off + c, :] = tap

    # Seed the im2col matrix with the block input x0.
    scatter_taps(x_ref[0], 0, C0)

    for l in range(L):
        # One MXU matmul per layer: (k, 9*Ct) @ (9*Ct, HW) -> (k, HW).
        acc = jnp.dot(w_ref[l], col_ref[...], preferred_element_type=jnp.float32)
        # Fused BatchNorm (eval affine) + ReLU.
        f = jnp.maximum(acc * scale_ref[l] + bias_ref[l], 0.0)
        # Lane-dense store of layer l's feature into its NCHW channel slice.
        o_ref[0, l * k:(l + 1) * k, :] = f
        if l + 1 < L:
            # Append f's taps so the next layer sees x_{l+1} = [..., f_l].
            scatter_taps(f, C0 + l * k, k)


# ----------------------------------------------------------------------------
# Host-side packing helpers (run once, outside the hot path)
# ----------------------------------------------------------------------------
def _make_tap_masks(H, W):
    """(9, 1, H*W) 0/1 masks: tap (dy,dx) is valid where the shifted source
    pixel lies inside the image (implements the conv's zero padding)."""
    HW = H * W
    y = np.arange(H)[:, None]
    x = np.arange(W)[None, :]
    masks = np.zeros((9, 1, HW), np.float32)
    for dy in range(3):
        for dx in range(3):
            valid = ((y + dy - 1 >= 0) & (y + dy - 1 < H) &
                     (x + dx - 1 >= 0) & (x + dx - 1 < W))
            masks[dy * 3 + dx, 0, :] = valid.reshape(HW).astype(np.float32)
    return jnp.asarray(masks)


def _pack_params(params, C0, k, L):
    """Stack per-layer conv weights into (L, k, 9*Ct), input channels permuted
    to the kernel's scratch order [x0, f_0, ..., f_{l-1}] and zero-padded to Ct."""
    Ct = C0 + (L - 1) * k
    w_list, s_list, b_list = [], [], []
    for l, layer in enumerate(params):
        w = layer["w_oihw"]                         # (k, Cin_l, 3, 3), PyTorch order
        cin = C0 + l * k
        # PyTorch input order for layer l is [f_{l-1}, ..., f_0, x0].
        perm = [l * k + c for c in range(C0)]       # x0 block
        for j in range(l):                          # f_j blocks
            perm += [(l - 1 - j) * k + cc for cc in range(k)]
        w_perm = w[:, jnp.asarray(perm, jnp.int32), :, :]
        w_pad = jnp.zeros((k, Ct, 3, 3), jnp.float32).at[:, :cin].set(w_perm)
        # -> (k, 3, 3, Ct) -> (k, 9*Ct); column index = (dy*3+dx)*Ct + ch.
        w_list.append(jnp.transpose(w_pad, (0, 2, 3, 1)).reshape(k, 9 * Ct))
        s_list.append(layer["scale"].reshape(k, 1))
        b_list.append(layer["bias"].reshape(k, 1))
    return jnp.stack(w_list), jnp.stack(s_list), jnp.stack(b_list)


def denseblock2_forward(x_nchw, params):
    """x_nchw: (N, C0, H, W) f32.  Returns (N, n_layers*k, H, W) f32 (NCHW)."""
    N, C0, H, W = x_nchw.shape
    L = len(params)
    k = params[0]["w_oihw"].shape[0]
    HW = H * W
    Ct = C0 + (L - 1) * k

    w_all, scale_all, bias_all = _pack_params(params, C0, k, L)
    masks = _make_tap_masks(H, W)
    x_flat = x_nchw.reshape(N, C0, HW)              # NCHW, spatial flattened (free)

    out_flat = pl.pallas_call(
        functools.partial(_denseblock_kernel, H=H, W=W, C0=C0, k=k, L=L),
        out_shape=jax.ShapeDtypeStruct((N, L * k, HW), jnp.float32),
        grid=(N,),
        in_specs=[
            pl.BlockSpec((1, C0, HW), lambda n: (n, 0, 0)),
            pl.BlockSpec((L, k, 9 * Ct), lambda n: (0, 0, 0)),
            pl.BlockSpec((L, k, 1), lambda n: (0, 0, 0)),
            pl.BlockSpec((L, k, 1), lambda n: (0, 0, 0)),
            pl.BlockSpec((9, 1, HW), lambda n: (0, 0, 0)),
        ],
        out_specs=pl.BlockSpec((1, L * k, HW), lambda n: (n, 0, 0)),
        scratch_shapes=[pltpu.VMEM((9 * Ct, HW), jnp.float32)],
        compiler_params=pltpu.CompilerParams(dimension_semantics=("parallel",)),
    )(x_flat, w_all, scale_all, bias_all, masks)
    return out_flat.reshape(N, L * k, H, W)


# ----------------------------------------------------------------------------
# Deterministic parameter init matching nn.Conv2d + nn.BatchNorm2d (eval) shapes
# ----------------------------------------------------------------------------
def init_params(key, n_layers, input_channel, k):
    eps = 1e-5
    params = []
    for i in range(n_layers):
        cin = input_channel + k * i
        key, k1, k2, k3, k4, k5, k6 = jax.random.split(key, 7)
        w_oihw = jax.random.normal(k1, (k, cin, 3, 3), jnp.float32) * 0.1
        conv_b = jax.random.normal(k2, (k,), jnp.float32) * 0.1
        gamma = 1.0 + 0.1 * jax.random.normal(k3, (k,), jnp.float32)
        beta = 0.1 * jax.random.normal(k4, (k,), jnp.float32)
        run_mean = 0.1 * jax.random.normal(k5, (k,), jnp.float32)
        run_var = 1.0 + 0.1 * jax.random.uniform(k6, (k,), jnp.float32)
        # Fold conv bias + BN running stats into a single affine (eval mode).
        scale = gamma / jnp.sqrt(run_var + eps)
        bias = (conv_b - run_mean) * scale + beta
        params.append({"w_oihw": w_oihw, "scale": scale, "bias": bias})
    return params


# ----------------------------------------------------------------------------
# Pure-JAX reference (mirrors the PyTorch forward) for correctness check
# ----------------------------------------------------------------------------
def _ref_forward(x_nchw, params):
    x = jnp.transpose(x_nchw, (0, 2, 3, 1))
    feats = []
    for layer in params:
        w_hwio = jnp.transpose(layer["w_oihw"], (2, 3, 1, 0))
        conv = jax.lax.conv_general_dilated(
            x, w_hwio, window_strides=(1, 1), padding=((1, 1), (1, 1)),
            dimension_numbers=("NHWC", "HWIO", "NHWC"))
        f = jnp.maximum(conv * layer["scale"] + layer["bias"], 0.0)
        feats.append(f)
        x = jnp.concatenate([f, x], axis=-1)          # torch.cat([feature, x], 1)
    out = jnp.concatenate(feats, axis=-1)             # [f0, f1, ..., f_{n-1}]
    return jnp.transpose(out, (0, 3, 1, 2))


if __name__ == "__main__":
    n_layers, input_channel, k = 3, 4, 4
    N, H, W = 2, 16, 16

    key = jax.random.PRNGKey(0)
    key, xkey = jax.random.split(key)
    x = jax.random.normal(xkey, (N, input_channel, H, W), jnp.float32)
    params = init_params(key, n_layers, input_channel, k)

    out = jax.block_until_ready(denseblock2_forward(x, params))
    assert out.shape == (N, n_layers * k, H, W), out.shape

    ref = jax.block_until_ready(_ref_forward(x, params))
    err = float(jnp.max(jnp.abs(out - ref)))
    assert jnp.allclose(out, ref, atol=1e-3, rtol=1e-3), err

    print("KERNEL_OK")
</pallas_src>

<mosaic_0001>
module attributes {stable_mosaic.version = 11 : i64} {
  func.func @_denseblock_kernel(%arg0: i32, %arg1: memref<1x4x256xf32, #tpu.memory_space<vmem>>, %arg2: memref<3x4x108xf32, #tpu.memory_space<vmem>>, %arg3: memref<3x4x1xf32, #tpu.memory_space<vmem>>, %arg4: memref<3x4x1xf32, #tpu.memory_space<vmem>>, %arg5: memref<9x1x256xf32, #tpu.memory_space<vmem>>, %arg6: memref<1x12x256xf32, #tpu.memory_space<vmem>>, %arg7: memref<108x256xf32, #tpu.memory_space<vmem>>) attributes {dimension_semantics = [#tpu.dimension_semantics<parallel>], iteration_bounds = array<i64: 2>, scalar_prefetch = 0 : i64, scratch_operands = 1 : i64, tpu.core_type = #tpu.core_type<tc>, window_params = [{transform_indices = @transform_0, window_bounds = array<i64: 1, 4, 256>}, {pipeline_mode = #tpu.pipeline_mode<synchronous>, transform_indices = @transform_1, window_bounds = array<i64: 3, 4, 108>}, {pipeline_mode = #tpu.pipeline_mode<synchronous>, transform_indices = @transform_2, window_bounds = array<i64: 3, 4, 1>}, {pipeline_mode = #tpu.pipeline_mode<synchronous>, transform_indices = @transform_3, window_bounds = array<i64: 3, 4, 1>}, {pipeline_mode = #tpu.pipeline_mode<synchronous>, transform_indices = @transform_4, window_bounds = array<i64: 9, 1, 256>}, {transform_indices = @transform_5, window_bounds = array<i64: 1, 12, 256>}]} {
    %cst = arith.constant 0.000000e+00 : f32
    %0 = vector.broadcast %cst : f32 to vector<108x256xf32>
    %c0 = arith.constant 0 : index
    %c0_0 = arith.constant 0 : index
    %1 = vector.load %arg7[%c0, %c0_0] : memref<108x256xf32, #tpu.memory_space<vmem>>, vector<108x256xf32>
    tpu.vector_store %arg7[%c0, %c0_0], %0 {strides = array<i32>} : memref<108x256xf32, #tpu.memory_space<vmem>>, vector<108x256xf32>,
    %c0_1 = arith.constant 0 : index
    %c0_2 = arith.constant 0 : index
    %c0_3 = arith.constant 0 : index
    %2 = vector.load %arg1[%c0_1, %c0_2, %c0_3] : memref<1x4x256xf32, #tpu.memory_space<vmem>>, vector<1x4x256xf32>
    %3 = vector.shape_cast %2 : vector<1x4x256xf32> to vector<4x256xf32>
    %4 = vector.extract_strided_slice %3 {offsets = [0, 239], sizes = [4, 17], strides = [1, 1]} : vector<4x256xf32> to vector<4x17xf32>
    %5 = vector.extract_strided_slice %3 {offsets = [0, 0], sizes = [4, 239], strides = [1, 1]} : vector<4x256xf32> to vector<4x239xf32>
    %6 = tpu.concatenate %4, %5 in 1 : vector<4x17xf32>, vector<4x239xf32> -> vector<4x256xf32>
    %c0_4 = arith.constant 0 : index
    %c0_5 = arith.constant 0 : index
    %c0_6 = arith.constant 0 : index
    %7 = vector.load %arg5[%c0_4, %c0_5, %c0_6] : memref<9x1x256xf32, #tpu.memory_space<vmem>>, vector<1x1x256xf32>
    %8 = vector.shape_cast %7 : vector<1x1x256xf32> to vector<1x256xf32>
    %9 = vector.broadcast %8 : vector<1x256xf32> to vector<4x256xf32>
    %10 = arith.mulf %6, %9 : vector<4x256xf32>
    %c0_7 = arith.constant 0 : index
    %c0_8 = arith.constant 0 : index
    %11 = vector.load %arg7[%c0_7, %c0_8] : memref<108x256xf32, #tpu.memory_space<vmem>>, vector<4x256xf32>
    tpu.vector_store %arg7[%c0_7, %c0_8], %10 {strides = array<i32>} : memref<108x256xf32, #tpu.memory_space<vmem>>, vector<4x256xf32>,
    %12 = vector.extract_strided_slice %3 {offsets = [0, 240], sizes = [4, 16], strides = [1, 1]} : vector<4x256xf32> to vector<4x16xf32>
    %13 = vector.extract_strided_slice %3 {offsets = [0, 0], sizes = [4, 240], strides = [1, 1]} : vector<4x256xf32> to vector<4x240xf32>
    %14 = tpu.concatenate %12, %13 in 1 : vector<4x16xf32>, vector<4x240xf32> -> vector<4x256xf32>
    %c1 = arith.constant 1 : index
    %c0_9 = arith.constant 0 : index
    %c0_10 = arith.constant 0 : index
    %15 = vector.load %arg5[%c1, %c0_9, %c0_10] : memref<9x1x256xf32, #tpu.memory_space<vmem>>, vector<1x1x256xf32>
    %16 = vector.shape_cast %15 : vector<1x1x256xf32> to vector<1x256xf32>
    %17 = vector.broadcast %16 : vector<1x256xf32> to vector<4x256xf32>
    %18 = arith.mulf %14, %17 : vector<4x256xf32>
    %c12 = arith.constant 12 : index
    %c0_11 = arith.constant 0 : index
    %19 = vector.load %arg7[%c12, %c0_11] : memref<108x256xf32, #tpu.memory_space<vmem>>, vector<4x256xf32>
    tpu.vector_store %arg7[%c12, %c0_11], %18 {strides = array<i32>} : memref<108x256xf32, #tpu.memory_space<vmem>>, vector<4x256xf32>,
    %20 = vector.extract_strided_slice %3 {offsets = [0, 241], sizes = [4, 15], strides = [1, 1]} : vector<4x256xf32> to vector<4x15xf32>
    %21 = vector.extract_strided_slice %3 {offsets = [0, 0], sizes = [4, 241], strides = [1, 1]} : vector<4x256xf32> to vector<4x241xf32>
    %22 = tpu.concatenate %20, %21 in 1 : vector<4x15xf32>, vector<4x241xf32> -> vector<4x256xf32>
    %c2 = arith.constant 2 : index
    %c0_12 = arith.constant 0 : index
    %c0_13 = arith.constant 0 : index
    %23 = vector.load %arg5[%c2, %c0_12, %c0_13] : memref<9x1x256xf32, #tpu.memory_space<vmem>>, vector<1x1x256xf32>
    %24 = vector.shape_cast %23 : vector<1x1x256xf32> to vector<1x256xf32>
    %25 = vector.broadcast %24 : vector<1x256xf32> to vector<4x256xf32>
    %26 = arith.mulf %22, %25 : vector<4x256xf32>
    %c24 = arith.constant 24 : index
    %c0_14 = arith.constant 0 : index
    %27 = vector.load %arg7[%c24, %c0_14] : memref<108x256xf32, #tpu.memory_space<vmem>>, vector<4x256xf32>
    tpu.vector_store %arg7[%c24, %c0_14], %26 {strides = array<i32>} : memref<108x256xf32, #tpu.memory_space<vmem>>, vector<4x256xf32>,
    %28 = vector.extract_strided_slice %3 {offsets = [0, 255], sizes = [4, 1], strides = [1, 1]} : vector<4x256xf32> to vector<4x1xf32>
    %29 = vector.extract_strided_slice %3 {offsets = [0, 0], sizes = [4, 255], strides = [1, 1]} : vector<4x256xf32> to vector<4x255xf32>
    %30 = tpu.concatenate %28, %29 in 1 : vector<4x1xf32>, vector<4x255xf32> -> vector<4x256xf32>
    %c3 = arith.constant 3 : index
    %c0_15 = arith.constant 0 : index
    %c0_16 = arith.constant 0 : index
    %31 = vector.load %arg5[%c3, %c0_15, %c0_16] : memref<9x1x256xf32, #tpu.memory_space<vmem>>, vector<1x1x256xf32>
    %32 = vector.shape_cast %31 : vector<1x1x256xf32> to vector<1x256xf32>
    %33 = vector.broadcast %32 : vector<1x256xf32> to vector<4x256xf32>
    %34 = arith.mulf %30, %33 : vector<4x256xf32>
    %c36 = arith.constant 36 : index
    %c0_17 = arith.constant 0 : index
    %35 = vector.load %arg7[%c36, %c0_17] : memref<108x256xf32, #tpu.memory_space<vmem>>, vector<4x256xf32>
    tpu.vector_store %arg7[%c36, %c0_17], %34 {strides = array<i32>} : memref<108x256xf32, #tpu.memory_space<vmem>>, vector<4x256xf32>,
    %c4 = arith.constant 4 : index
    %c0_18 = arith.constant 0 : index
    %c0_19 = arith.constant 0 : index
    %36 = vector.load %arg5[%c4, %c0_18, %c0_19] : memref<9x1x256xf32, #tpu.memory_space<vmem>>, vector<1x1x256xf32>
    %37 = vector.shape_cast %36 : vector<1x1x256xf32> to vector<1x256xf32>
    %38 = vector.broadcast %37 : vector<1x256xf32> to vector<4x256xf32>
    %39 = arith.mulf %3, %38 : vector<4x256xf32>
    %c48 = arith.constant 48 : index
    %c0_20 = arith.constant 0 : index
    %40 = vector.load %arg7[%c48, %c0_20] : memref<108x256xf32, #tpu.memory_space<vmem>>, vector<4x256xf32>
    tpu.vector_store %arg7[%c48, %c0_20], %39 {strides = array<i32>} : memref<108x256xf32, #tpu.memory_space<vmem>>, vector<4x256xf32>,
    %41 = vector.extract_strided_slice %3 {offsets = [0, 1], sizes = [4, 255], strides = [1, 1]} : vector<4x256xf32> to vector<4x255xf32>
    %42 = vector.extract_strided_slice %3 {offsets = [0, 0], sizes = [4, 1], strides = [1, 1]} : vector<4x256xf32> to vector<4x1xf32>
    %43 = tpu.concatenate %41, %42 in 1 : vector<4x255xf32>, vector<4x1xf32> -> vector<4x256xf32>
    %c5 = arith.constant 5 : index
    %c0_21 = arith.constant 0 : index
    %c0_22 = arith.constant 0 : index
    %44 = vector.load %arg5[%c5, %c0_21, %c0_22] : memref<9x1x256xf32, #tpu.memory_space<vmem>>, vector<1x1x256xf32>
    %45 = vector.shape_cast %44 : vector<1x1x256xf32> to vector<1x256xf32>
    %46 = vector.broadcast %45 : vector<1x256xf32> to vector<4x256xf32>
    %47 = arith.mulf %43, %46 : vector<4x256xf32>
    %c60 = arith.constant 60 : index
    %c0_23 = arith.constant 0 : index
    %48 = vector.load %arg7[%c60, %c0_23] : memref<108x256xf32, #tpu.memory_space<vmem>>, vector<4x256xf32>
    tpu.vector_store %arg7[%c60, %c0_23], %47 {strides = array<i32>} : memref<108x256xf32, #tpu.memory_space<vmem>>, vector<4x256xf32>,
    %49 = vector.extract_strided_slice %3 {offsets = [0, 15], sizes = [4, 241], strides = [1, 1]} : vector<4x256xf32> to vector<4x241xf32>
    %50 = vector.extract_strided_slice %3 {offsets = [0, 0], sizes = [4, 15], strides = [1, 1]} : vector<4x256xf32> to vector<4x15xf32>
    %51 = tpu.concatenate %49, %50 in 1 : vector<4x241xf32>, vector<4x15xf32> -> vector<4x256xf32>
    %c6 = arith.constant 6 : index
    %c0_24 = arith.constant 0 : index
    %c0_25 = arith.constant 0 : index
    %52 = vector.load %arg5[%c6, %c0_24, %c0_25] : memref<9x1x256xf32, #tpu.memory_space<vmem>>, vector<1x1x256xf32>
    %53 = vector.shape_cast %52 : vector<1x1x256xf32> to vector<1x256xf32>
    %54 = vector.broadcast %53 : vector<1x256xf32> to vector<4x256xf32>
    %55 = arith.mulf %51, %54 : vector<4x256xf32>
    %c72 = arith.constant 72 : index
    %c0_26 = arith.constant 0 : index
    %56 = vector.load %arg7[%c72, %c0_26] : memref<108x256xf32, #tpu.memory_space<vmem>>, vector<4x256xf32>
    tpu.vector_store %arg7[%c72, %c0_26], %55 {strides = array<i32>} : memref<108x256xf32, #tpu.memory_space<vmem>>, vector<4x256xf32>,
    %57 = vector.extract_strided_slice %3 {offsets = [0, 16], sizes = [4, 240], strides = [1, 1]} : vector<4x256xf32> to vector<4x240xf32>
    %58 = vector.extract_strided_slice %3 {offsets = [0, 0], sizes = [4, 16], strides = [1, 1]} : vector<4x256xf32> to vector<4x16xf32>
    %59 = tpu.concatenate %57, %58 in 1 : vector<4x240xf32>, vector<4x16xf32> -> vector<4x256xf32>
    %c7 = arith.constant 7 : index
    %c0_27 = arith.constant 0 : index
    %c0_28 = arith.constant 0 : index
    %60 = vector.load %arg5[%c7, %c0_27, %c0_28] : memref<9x1x256xf32, #tpu.memory_space<vmem>>, vector<1x1x256xf32>
    %61 = vector.shape_cast %60 : vector<1x1x256xf32> to vector<1x256xf32>
    %62 = vector.broadcast %61 : vector<1x256xf32> to vector<4x256xf32>
    %63 = arith.mulf %59, %62 : vector<4x256xf32>
    %c84 = arith.constant 84 : index
    %c0_29 = arith.constant 0 : index
    %64 = vector.load %arg7[%c84, %c0_29] : memref<108x256xf32, #tpu.memory_space<vmem>>, vector<4x256xf32>
    tpu.vector_store %arg7[%c84, %c0_29], %63 {strides = array<i32>} : memref<108x256xf32, #tpu.memory_space<vmem>>, vector<4x256xf32>,
    %65 = vector.extract_strided_slice %3 {offsets = [0, 17], sizes = [4, 239], strides = [1, 1]} : vector<4x256xf32> to vector<4x239xf32>
    %66 = vector.extract_strided_slice %3 {offsets = [0, 0], sizes = [4, 17], strides = [1, 1]} : vector<4x256xf32> to vector<4x17xf32>
    %67 = tpu.concatenate %65, %66 in 1 : vector<4x239xf32>, vector<4x17xf32> -> vector<4x256xf32>
    %c8 = arith.constant 8 : index
    %c0_30 = arith.constant 0 : index
    %c0_31 = arith.constant 0 : index
    %68 = vector.load %arg5[%c8, %c0_30, %c0_31] : memref<9x1x256xf32, #tpu.memory_space<vmem>>, vector<1x1x256xf32>
    %69 = vector.shape_cast %68 : vector<1x1x256xf32> to vector<1x256xf32>
    %70 = vector.broadcast %69 : vector<1x256xf32> to vector<4x256xf32>
    %71 = arith.mulf %67, %70 : vector<4x256xf32>
    %c96 = arith.constant 96 : index
    %c0_32 = arith.constant 0 : index
    %72 = vector.load %arg7[%c96, %c0_32] : memref<108x256xf32, #tpu.memory_space<vmem>>, vector<4x256xf32>
    tpu.vector_store %arg7[%c96, %c0_32], %71 {strides = array<i32>} : memref<108x256xf32, #tpu.memory_space<vmem>>, vector<4x256xf32>,
    %c0_33 = arith.constant 0 : index
    %c0_34 = arith.constant 0 : index
    %c0_35 = arith.constant 0 : index
    %73 = vector.load %arg2[%c0_33, %c0_34, %c0_35] : memref<3x4x108xf32, #tpu.memory_space<vmem>>, vector<1x4x108xf32>
    %74 = vector.shape_cast %73 : vector<1x4x108xf32> to vector<4x108xf32>
    %c0_36 = arith.constant 0 : index
    %c0_37 = arith.constant 0 : index
    %75 = vector.load %arg7[%c0_36, %c0_37] : memref<108x256xf32, #tpu.memory_space<vmem>>, vector<108x256xf32>
    %cst_38 = arith.constant dense<0.000000e+00> : vector<4x256xf32>
    %76 = tpu.matmul %74, %75, %cst_38 {dimension_numbers = #tpu.dot_dimension_numbers<[1], [0], [0], [1], [0, 0, 1, 1], [], []>} : vector<4x108xf32>, vector<108x256xf32>, vector<4x256xf32> -> vector<4x256xf32>
    %c0_39 = arith.constant 0 : index
    %c0_40 = arith.constant 0 : index
    %c0_41 = arith.constant 0 : index
    %77 = vector.load %arg3[%c0_39, %c0_40, %c0_41] : memref<3x4x1xf32, #tpu.memory_space<vmem>>, vector<1x4x1xf32>
    %78 = vector.shape_cast %77 : vector<1x4x1xf32> to vector<4x1xf32>
    %79 = vector.broadcast %78 : vector<4x1xf32> to vector<4x256xf32>
    %80 = arith.mulf %76, %79 : vector<4x256xf32>
    %c0_42 = arith.constant 0 : index
    %c0_43 = arith.constant 0 : index
    %c0_44 = arith.constant 0 : index
    %81 = vector.load %arg4[%c0_42, %c0_43, %c0_44] : memref<3x4x1xf32, #tpu.memory_space<vmem>>, vector<1x4x1xf32>
    %82 = vector.shape_cast %81 : vector<1x4x1xf32> to vector<4x1xf32>
    %83 = vector.broadcast %82 : vector<4x1xf32> to vector<4x256xf32>
    %84 = arith.addf %80, %83 : vector<4x256xf32>
    %cst_45 = arith.constant 0.000000e+00 : f32
    %85 = vector.broadcast %cst_45 : f32 to vector<4x256xf32>
    %86 = arith.maximumf %84, %85 : vector<4x256xf32>
    %c0_46 = arith.constant 0 : index
    %c0_47 = arith.constant 0 : index
    %c0_48 = arith.constant 0 : index
    %87 = vector.load %arg6[%c0_46, %c0_47, %c0_48] : memref<1x12x256xf32, #tpu.memory_space<vmem>>, vector<1x4x256xf32>
    %88 = vector.shape_cast %87 : vector<1x4x256xf32> to vector<4x256xf32>
    %89 = vector.shape_cast %86 : vector<4x256xf32> to vector<1x4x256xf32>
    tpu.vector_store %arg6[%c0_46, %c0_47, %c0_48], %89 {strides = array<i32>} : memref<1x12x256xf32, #tpu.memory_space<vmem>>, vector<1x4x256xf32>,
    %90 = vector.extract_strided_slice %86 {offsets = [0, 239], sizes = [4, 17], strides = [1, 1]} : vector<4x256xf32> to vector<4x17xf32>
    %91 = vector.extract_strided_slice %86 {offsets = [0, 0], sizes = [4, 239], strides = [1, 1]} : vector<4x256xf32> to vector<4x239xf32>
    %92 = tpu.concatenate %90, %91 in 1 : vector<4x17xf32>, vector<4x239xf32> -> vector<4x256xf32>
    %c0_49 = arith.constant 0 : index
    %c0_50 = arith.constant 0 : index
    %c0_51 = arith.constant 0 : index
    %93 = vector.load %arg5[%c0_49, %c0_50, %c0_51] : memref<9x1x256xf32, #tpu.memory_space<vmem>>, vector<1x1x256xf32>
    %94 = vector.shape_cast %93 : vector<1x1x256xf32> to vector<1x256xf32>
    %95 = vector.broadcast %94 : vector<1x256xf32> to vector<4x256xf32>
    %96 = arith.mulf %92, %95 : vector<4x256xf32>
    %c4_52 = arith.constant 4 : index
    %c0_53 = arith.constant 0 : index
    %97 = vector.load %arg7[%c4_52, %c0_53] : memref<108x256xf32, #tpu.memory_space<vmem>>, vector<4x256xf32>
    tpu.vector_store %arg7[%c4_52, %c0_53], %96 {strides = array<i32>} : memref<108x256xf32, #tpu.memory_space<vmem>>, vector<4x256xf32>,
    %98 = vector.extract_strided_slice %86 {offsets = [0, 240], sizes = [4, 16], strides = [1, 1]} : vector<4x256xf32> to vector<4x16xf32>
    %99 = vector.extract_strided_slice %86 {offsets = [0, 0], sizes = [4, 240], strides = [1, 1]} : vector<4x256xf32> to vector<4x240xf32>
    %100 = tpu.concatenate %98, %99 in 1 : vector<4x16xf32>, vector<4x240xf32> -> vector<4x256xf32>
    %c1_54 = arith.constant 1 : index
    %c0_55 = arith.constant 0 : index
    %c0_56 = arith.constant 0 : index
    %101 = vector.load %arg5[%c1_54, %c0_55, %c0_56] : memref<9x1x256xf32, #tpu.memory_space<vmem>>, vector<1x1x256xf32>
    %102 = vector.shape_cast %101 : vector<1x1x256xf32> to vector<1x256xf32>
    %103 = vector.broadcast %102 : vector<1x256xf32> to vector<4x256xf32>
    %104 = arith.mulf %100, %103 : vector<4x256xf32>
    %c16 = arith.constant 16 : index
    %c0_57 = arith.constant 0 : index
    %105 = vector.load %arg7[%c16, %c0_57] : memref<108x256xf32, #tpu.memory_space<vmem>>, vector<4x256xf32>
    tpu.vector_store %arg7[%c16, %c0_57], %104 {strides = array<i32>} : memref<108x256xf32, #tpu.memory_space<vmem>>, vector<4x256xf32>,
    %106 = vector.extract_strided_slice %86 {offsets = [0, 241], sizes = [4, 15], strides = [1, 1]} : vector<4x256xf32> to vector<4x15xf32>
    %107 = vector.extract_strided_slice %86 {offsets = [0, 0], sizes = [4, 241], strides = [1, 1]} : vector<4x256xf32> to vector<4x241xf32>
    %108 = tpu.concatenate %106, %107 in 1 : vector<4x15xf32>, vector<4x241xf32> -> vector<4x256xf32>
    %c2_58 = arith.constant 2 : index
    %c0_59 = arith.constant 0 : index
    %c0_60 = arith.constant 0 : index
    %109 = vector.load %arg5[%c2_58, %c0_59, %c0_60] : memref<9x1x256xf32, #tpu.memory_space<vmem>>, vector<1x1x256xf32>
    %110 = vector.shape_cast %109 : vector<1x1x256xf32> to vector<1x256xf32>
    %111 = vector.broadcast %110 : vector<1x256xf32> to vector<4x256xf32>
    %112 = arith.mulf %108, %111 : vector<4x256xf32>
    %c28 = arith.constant 28 : index
    %c0_61 = arith.constant 0 : index
    %113 = vector.load %arg7[%c28, %c0_61] : memref<108x256xf32, #tpu.memory_space<vmem>>, vector<4x256xf32>
    tpu.vector_store %arg7[%c28, %c0_61], %112 {strides = array<i32>} : memref<108x256xf32, #tpu.memory_space<vmem>>, vector<4x256xf32>,
    %114 = vector.extract_strided_slice %86 {offsets = [0, 255], sizes = [4, 1], strides = [1, 1]} : vector<4x256xf32> to vector<4x1xf32>
    %115 = vector.extract_strided_slice %86 {offsets = [0, 0], sizes = [4, 255], strides = [1, 1]} : vector<4x256xf32> to vector<4x255xf32>
    %116 = tpu.concatenate %114, %115 in 1 : vector<4x1xf32>, vector<4x255xf32> -> vector<4x256xf32>
    %c3_62 = arith.constant 3 : index
    %c0_63 = arith.constant 0 : index
    %c0_64 = arith.constant 0 : index
    %117 = vector.load %arg5[%c3_62, %c0_63, %c0_64] : memref<9x1x256xf32, #tpu.memory_space<vmem>>, vector<1x1x256xf32>
    %118 = vector.shape_cast %117 : vector<1x1x256xf32> to vector<1x256xf32>
    %119 = vector.broadcast %118 : vector<1x256xf32> to vector<4x256xf32>
    %120 = arith.mulf %116, %119 : vector<4x256xf32>
    %c40 = arith.constant 40 : index
    %c0_65 = arith.constant 0 : index
    %121 = vector.load %arg7[%c40, %c0_65] : memref<108x256xf32, #tpu.memory_space<vmem>>, vector<4x256xf32>
    tpu.vector_store %arg7[%c40, %c0_65], %120 {strides = array<i32>} : memref<108x256xf32, #tpu.memory_space<vmem>>, vector<4x256xf32>,
    %c4_66 = arith.constant 4 : index
    %c0_67 = arith.constant 0 : index
    %c0_68 = arith.constant 0 : index
    %122 = vector.load %arg5[%c4_66, %c0_67, %c0_68] : memref<9x1x256xf32, #tpu.memory_space<vmem>>, vector<1x1x256xf32>
    %123 = vector.shape_cast %122 : vector<1x1x256xf32> to vector<1x256xf32>
    %124 = vector.broadcast %123 : vector<1x256xf32> to vector<4x256xf32>
    %125 = arith.mulf %86, %124 : vector<4x256xf32>
    %c52 = arith.constant 52 : index
    %c0_69 = arith.constant 0 : index
    %126 = vector.load %arg7[%c52, %c0_69] : memref<108x256xf32, #tpu.memory_space<vmem>>, vector<4x256xf32>
    tpu.vector_store %arg7[%c52, %c0_69], %125 {strides = array<i32>} : memref<108x256xf32, #tpu.memory_space<vmem>>, vector<4x256xf32>,
    %127 = vector.extract_strided_slice %86 {offsets = [0, 1], sizes = [4, 255], strides = [1, 1]} : vector<4x256xf32> to vector<4x255xf32>
    %128 = vector.extract_strided_slice %86 {offsets = [0, 0], sizes = [4, 1], strides = [1, 1]} : vector<4x256xf32> to vector<4x1xf32>
    %129 = tpu.concatenate %127, %128 in 1 : vector<4x255xf32>, vector<4x1xf32> -> vector<4x256xf32>
    %c5_70 = arith.constant 5 : index
    %c0_71 = arith.constant 0 : index
    %c0_72 = arith.constant 0 : index
    %130 = vector.load %arg5[%c5_70, %c0_71, %c0_72] : memref<9x1x256xf32, #tpu.memory_space<vmem>>, vector<1x1x256xf32>
    %131 = vector.shape_cast %130 : vector<1x1x256xf32> to vector<1x256xf32>
    %132 = vector.broadcast %131 : vector<1x256xf32> to vector<4x256xf32>
    %133 = arith.mulf %129, %132 : vector<4x256xf32>
    %c64 = arith.constant 64 : index
    %c0_73 = arith.constant 0 : index
    %134 = vector.load %arg7[%c64, %c0_73] : memref<108x256xf32, #tpu.memory_space<vmem>>, vector<4x256xf32>
    tpu.vector_store %arg7[%c64, %c0_73], %133 {strides = array<i32>} : memref<108x256xf32, #tpu.memory_space<vmem>>, vector<4x256xf32>,
    %135 = vector.extract_strided_slice %86 {offsets = [0, 15], sizes = [4, 241], strides = [1, 1]} : vector<4x256xf32> to vector<4x241xf32>
    %136 = vector.extract_strided_slice %86 {offsets = [0, 0], sizes = [4, 15], strides = [1, 1]} : vector<4x256xf32> to vector<4x15xf32>
    %137 = tpu.concatenate %135, %136 in 1 : vector<4x241xf32>, vector<4x15xf32> -> vector<4x256xf32>
    %c6_74 = arith.constant 6 : index
    %c0_75 = arith.constant 0 : index
    %c0_76 = arith.constant 0 : index
    %138 = vector.load %arg5[%c6_74, %c0_75, %c0_76] : memref<9x1x256xf32, #tpu.memory_space<vmem>>, vector<1x1x256xf32>
    %139 = vector.shape_cast %138 : vector<1x1x256xf32> to vector<1x256xf32>
    %140 = vector.broadcast %139 : vector<1x256xf32> to vector<4x256xf32>
    %141 = arith.mulf %137, %140 : vector<4x256xf32>
    %c76 = arith.constant 76 : index
    %c0_77 = arith.constant 0 : index
    %142 = vector.load %arg7[%c76, %c0_77] : memref<108x256xf32, #tpu.memory_space<vmem>>, vector<4x256xf32>
    tpu.vector_store %arg7[%c76, %c0_77], %141 {strides = array<i32>} : memref<108x256xf32, #tpu.memory_space<vmem>>, vector<4x256xf32>,
    %143 = vector.extract_strided_slice %86 {offsets = [0, 16], sizes = [4, 240], strides = [1, 1]} : vector<4x256xf32> to vector<4x240xf32>
    %144 = vector.extract_strided_slice %86 {offsets = [0, 0], sizes = [4, 16], strides = [1, 1]} : vector<4x256xf32> to vector<4x16xf32>
    %145 = tpu.concatenate %143, %144 in 1 : vector<4x240xf32>, vector<4x16xf32> -> vector<4x256xf32>
    %c7_78 = arith.constant 7 : index
    %c0_79 = arith.constant 0 : index
    %c0_80 = arith.constant 0 : index
    %146 = vector.load %arg5[%c7_78, %c0_79, %c0_80] : memref<9x1x256xf32, #tpu.memory_space<vmem>>, vector<1x1x256xf32>
    %147 = vector.shape_cast %146 : vector<1x1x256xf32> to vector<1x256xf32>
    %148 = vector.broadcast %147 : vector<1x256xf32> to vector<4x256xf32>
    %149 = arith.mulf %145, %148 : vector<4x256xf32>
    %c88 = arith.constant 88 : index
    %c0_81 = arith.constant 0 : index
    %150 = vector.load %arg7[%c88, %c0_81] : memref<108x256xf32, #tpu.memory_space<vmem>>, vector<4x256xf32>
    tpu.vector_store %arg7[%c88, %c0_81], %149 {strides = array<i32>} : memref<108x256xf32, #tpu.memory_space<vmem>>, vector<4x256xf32>,
    %151 = vector.extract_strided_slice %86 {offsets = [0, 17], sizes = [4, 239], strides = [1, 1]} : vector<4x256xf32> to vector<4x239xf32>
    %152 = vector.extract_strided_slice %86 {offsets = [0, 0], sizes = [4, 17], strides = [1, 1]} : vector<4x256xf32> to vector<4x17xf32>
    %153 = tpu.concatenate %151, %152 in 1 : vector<4x239xf32>, vector<4x17xf32> -> vector<4x256xf32>
    %c8_82 = arith.constant 8 : index
    %c0_83 = arith.constant 0 : index
    %c0_84 = arith.constant 0 : index
    %154 = vector.load %arg5[%c8_82, %c0_83, %c0_84] : memref<9x1x256xf32, #tpu.memory_space<vmem>>, vector<1x1x256xf32>
    %155 = vector.shape_cast %154 : vector<1x1x256xf32> to vector<1x256xf32>
    %156 = vector.broadcast %155 : vector<1x256xf32> to vector<4x256xf32>
    %157 = arith.mulf %153, %156 : vector<4x256xf32>
    %c100 = arith.constant 100 : index
    %c0_85 = arith.constant 0 : index
    %158 = vector.load %arg7[%c100, %c0_85] : memref<108x256xf32, #tpu.memory_space<vmem>>, vector<4x256xf32>
    tpu.vector_store %arg7[%c100, %c0_85], %157 {strides = array<i32>} : memref<108x256xf32, #tpu.memory_space<vmem>>, vector<4x256xf32>,
    %c1_86 = arith.constant 1 : index
    %c0_87 = arith.constant 0 : index
    %c0_88 = arith.constant 0 : index
    %159 = vector.load %arg2[%c1_86, %c0_87, %c0_88] : memref<3x4x108xf32, #tpu.memory_space<vmem>>, vector<1x4x108xf32>
    %160 = vector.shape_cast %159 : vector<1x4x108xf32> to vector<4x108xf32>
    %c0_89 = arith.constant 0 : index
    %c0_90 = arith.constant 0 : index
    %161 = vector.load %arg7[%c0_89, %c0_90] : memref<108x256xf32, #tpu.memory_space<vmem>>, vector<108x256xf32>
    %cst_91 = arith.constant dense<0.000000e+00> : vector<4x256xf32>
    %162 = tpu.matmul %160, %161, %cst_91 {dimension_numbers = #tpu.dot_dimension_numbers<[1], [0], [0], [1], [0, 0, 1, 1], [], []>} : vector<4x108xf32>, vector<108x256xf32>, vector<4x256xf32> -> vector<4x256xf32>
    %c1_92 = arith.constant 1 : index
    %c0_93 = arith.constant 0 : index
    %c0_94 = arith.constant 0 : index
    %163 = vector.load %arg3[%c1_92, %c0_93, %c0_94] : memref<3x4x1xf32, #tpu.memory_space<vmem>>, vector<1x4x1xf32>
    %164 = vector.shape_cast %163 : vector<1x4x1xf32> to vector<4x1xf32>
    %165 = vector.broadcast %164 : vector<4x1xf32> to vector<4x256xf32>
    %166 = arith.mulf %162, %165 : vector<4x256xf32>
    %c1_95 = arith.constant 1 : index
    %c0_96 = arith.constant 0 : index
    %c0_97 = arith.constant 0 : index
    %167 = vector.load %arg4[%c1_95, %c0_96, %c0_97] : memref<3x4x1xf32, #tpu.memory_space<vmem>>, vector<1x4x1xf32>
    %168 = vector.shape_cast %167 : vector<1x4x1xf32> to vector<4x1xf32>
    %169 = vector.broadcast %168 : vector<4x1xf32> to vector<4x256xf32>
    %170 = arith.addf %166, %169 : vector<4x256xf32>
    %cst_98 = arith.constant 0.000000e+00 : f32
    %171 = vector.broadcast %cst_98 : f32 to vector<4x256xf32>
    %172 = arith.maximumf %170, %171 : vector<4x256xf32>
    %c0_99 = arith.constant 0 : index
    %c4_100 = arith.constant 4 : index
    %c0_101 = arith.constant 0 : index
    %173 = vector.load %arg6[%c0_99, %c4_100, %c0_101] : memref<1x12x256xf32, #tpu.memory_space<vmem>>, vector<1x4x256xf32>
    %174 = vector.shape_cast %173 : vector<1x4x256xf32> to vector<4x256xf32>
    %175 = vector.shape_cast %172 : vector<4x256xf32> to vector<1x4x256xf32>
    tpu.vector_store %arg6[%c0_99, %c4_100, %c0_101], %175 {strides = array<i32>} : memref<1x12x256xf32, #tpu.memory_space<vmem>>, vector<1x4x256xf32>,
    %176 = vector.extract_strided_slice %172 {offsets = [0, 239], sizes = [4, 17], strides = [1, 1]} : vector<4x256xf32> to vector<4x17xf32>
    %177 = vector.extract_strided_slice %172 {offsets = [0, 0], sizes = [4, 239], strides = [1, 1]} : vector<4x256xf32> to vector<4x239xf32>
    %178 = tpu.concatenate %176, %177 in 1 : vector<4x17xf32>, vector<4x239xf32> -> vector<4x256xf32>
    %c0_102 = arith.constant 0 : index
    %c0_103 = arith.constant 0 : index
    %c0_104 = arith.constant 0 : index
    %179 = vector.load %arg5[%c0_102, %c0_103, %c0_104] : memref<9x1x256xf32, #tpu.memory_space<vmem>>, vector<1x1x256xf32>
    %180 = vector.shape_cast %179 : vector<1x1x256xf32> to vector<1x256xf32>
    %181 = vector.broadcast %180 : vector<1x256xf32> to vector<4x256xf32>
    %182 = arith.mulf %178, %181 : vector<4x256xf32>
    %c8_105 = arith.constant 8 : index
    %c0_106 = arith.constant 0 : index
    %183 = vector.load %arg7[%c8_105, %c0_106] : memref<108x256xf32, #tpu.memory_space<vmem>>, vector<4x256xf32>
    tpu.vector_store %arg7[%c8_105, %c0_106], %182 {strides = array<i32>} : memref<108x256xf32, #tpu.memory_space<vmem>>, vector<4x256xf32>,
    %184 = vector.extract_strided_slice %172 {offsets = [0, 240], sizes = [4, 16], strides = [1, 1]} : vector<4x256xf32> to vector<4x16xf32>
    %185 = vector.extract_strided_slice %172 {offsets = [0, 0], sizes = [4, 240], strides = [1, 1]} : vector<4x256xf32> to vector<4x240xf32>
    %186 = tpu.concatenate %184, %185 in 1 : vector<4x16xf32>, vector<4x240xf32> -> vector<4x256xf32>
    %c1_107 = arith.constant 1 : index
    %c0_108 = arith.constant 0 : index
    %c0_109 = arith.constant 0 : index
    %187 = vector.load %arg5[%c1_107, %c0_108, %c0_109] : memref<9x1x256xf32, #tpu.memory_space<vmem>>, vector<1x1x256xf32>
    %188 = vector.shape_cast %187 : vector<1x1x256xf32> to vector<1x256xf32>
    %189 = vector.broadcast %188 : vector<1x256xf32> to vector<4x256xf32>
    %190 = arith.mulf %186, %189 : vector<4x256xf32>
    %c20 = arith.constant 20 : index
    %c0_110 = arith.constant 0 : index
    %191 = vector.load %arg7[%c20, %c0_110] : memref<108x256xf32, #tpu.memory_space<vmem>>, vector<4x256xf32>
    tpu.vector_store %arg7[%c20, %c0_110], %190 {strides = array<i32>} : memref<108x256xf32, #tpu.memory_space<vmem>>, vector<4x256xf32>,
    %192 = vector.extract_strided_slice %172 {offsets = [0, 241], sizes = [4, 15], strides = [1, 1]} : vector<4x256xf32> to vector<4x15xf32>
    %193 = vector.extract_strided_slice %172 {offsets = [0, 0], sizes = [4, 241], strides = [1, 1]} : vector<4x256xf32> to vector<4x241xf32>
    %194 = tpu.concatenate %192, %193 in 1 : vector<4x15xf32>, vector<4x241xf32> -> vector<4x256xf32>
    %c2_111 = arith.constant 2 : index
    %c0_112 = arith.constant 0 : index
    %c0_113 = arith.constant 0 : index
    %195 = vector.load %arg5[%c2_111, %c0_112, %c0_113] : memref<9x1x256xf32, #tpu.memory_space<vmem>>, vector<1x1x256xf32>
    %196 = vector.shape_cast %195 : vector<1x1x256xf32> to vector<1x256xf32>
    %197 = vector.broadcast %196 : vector<1x256xf32> to vector<4x256xf32>
    %198 = arith.mulf %194, %197 : vector<4x256xf32>
    %c32 = arith.constant 32 : index
    %c0_114 = arith.constant 0 : index
    %199 = vector.load %arg7[%c32, %c0_114] : memref<108x256xf32, #tpu.memory_space<vmem>>, vector<4x256xf32>
    tpu.vector_store %arg7[%c32, %c0_114], %198 {strides = array<i32>} : memref<108x256xf32, #tpu.memory_space<vmem>>, vector<4x256xf32>,
    %200 = vector.extract_strided_slice %172 {offsets = [0, 255], sizes = [4, 1], strides = [1, 1]} : vector<4x256xf32> to vector<4x1xf32>
    %201 = vector.extract_strided_slice %172 {offsets = [0, 0], sizes = [4, 255], strides = [1, 1]} : vector<4x256xf32> to vector<4x255xf32>
    %202 = tpu.concatenate %200, %201 in 1 : vector<4x1xf32>, vector<4x255xf32> -> vector<4x256xf32>
    %c3_115 = arith.constant 3 : index
    %c0_116 = arith.constant 0 : index
    %c0_117 = arith.constant 0 : index
    %203 = vector.load %arg5[%c3_115, %c0_116, %c0_117] : memref<9x1x256xf32, #tpu.memory_space<vmem>>, vector<1x1x256xf32>
    %204 = vector.shape_cast %203 : vector<1x1x256xf32> to vector<1x256xf32>
    %205 = vector.broadcast %204 : vector<1x256xf32> to vector<4x256xf32>
    %206 = arith.mulf %202, %205 : vector<4x256xf32>
    %c44 = arith.constant 44 : index
    %c0_118 = arith.constant 0 : index
    %207 = vector.load %arg7[%c44, %c0_118] : memref<108x256xf32, #tpu.memory_space<vmem>>, vector<4x256xf32>
    tpu.vector_store %arg7[%c44, %c0_118], %206 {strides = array<i32>} : memref<108x256xf32, #tpu.memory_space<vmem>>, vector<4x256xf32>,
    %c4_119 = arith.constant 4 : index
    %c0_120 = arith.constant 0 : index
    %c0_121 = arith.constant 0 : index
    %208 = vector.load %arg5[%c4_119, %c0_120, %c0_121] : memref<9x1x256xf32, #tpu.memory_space<vmem>>, vector<1x1x256xf32>
    %209 = vector.shape_cast %208 : vector<1x1x256xf32> to vector<1x256xf32>
    %210 = vector.broadcast %209 : vector<1x256xf32> to vector<4x256xf32>
    %211 = arith.mulf %172, %210 : vector<4x256xf32>
    %c56 = arith.constant 56 : index
    %c0_122 = arith.constant 0 : index
    %212 = vector.load %arg7[%c56, %c0_122] : memref<108x256xf32, #tpu.memory_space<vmem>>, vector<4x256xf32>
    tpu.vector_store %arg7[%c56, %c0_122], %211 {strides = array<i32>} : memref<108x256xf32, #tpu.memory_space<vmem>>, vector<4x256xf32>,
    %213 = vector.extract_strided_slice %172 {offsets = [0, 1], sizes = [4, 255], strides = [1, 1]} : vector<4x256xf32> to vector<4x255xf32>
    %214 = vector.extract_strided_slice %172 {offsets = [0, 0], sizes = [4, 1], strides = [1, 1]} : vector<4x256xf32> to vector<4x1xf32>
    %215 = tpu.concatenate %213, %214 in 1 : vector<4x255xf32>, vector<4x1xf32> -> vector<4x256xf32>
    %c5_123 = arith.constant 5 : index
    %c0_124 = arith.constant 0 : index
    %c0_125 = arith.constant 0 : index
    %216 = vector.load %arg5[%c5_123, %c0_124, %c0_125] : memref<9x1x256xf32, #tpu.memory_space<vmem>>, vector<1x1x256xf32>
    %217 = vector.shape_cast %216 : vector<1x1x256xf32> to vector<1x256xf32>
    %218 = vector.broadcast %217 : vector<1x256xf32> to vector<4x256xf32>
    %219 = arith.mulf %215, %218 : vector<4x256xf32>
    %c68 = arith.constant 68 : index
    %c0_126 = arith.constant 0 : index
    %220 = vector.load %arg7[%c68, %c0_126] : memref<108x256xf32, #tpu.memory_space<vmem>>, vector<4x256xf32>
    tpu.vector_store %arg7[%c68, %c0_126], %219 {strides = array<i32>} : memref<108x256xf32, #tpu.memory_space<vmem>>, vector<4x256xf32>,
    %221 = vector.extract_strided_slice %172 {offsets = [0, 15], sizes = [4, 241], strides = [1, 1]} : vector<4x256xf32> to vector<4x241xf32>
    %222 = vector.extract_strided_slice %172 {offsets = [0, 0], sizes = [4, 15], strides = [1, 1]} : vector<4x256xf32> to vector<4x15xf32>
    %223 = tpu.concatenate %221, %222 in 1 : vector<4x241xf32>, vector<4x15xf32> -> vector<4x256xf32>
    %c6_127 = arith.constant 6 : index
    %c0_128 = arith.constant 0 : index
    %c0_129 = arith.constant 0 : index
    %224 = vector.load %arg5[%c6_127, %c0_128, %c0_129] : memref<9x1x256xf32, #tpu.memory_space<vmem>>, vector<1x1x256xf32>
    %225 = vector.shape_cast %224 : vector<1x1x256xf32> to vector<1x256xf32>
    %226 = vector.broadcast %225 : vector<1x256xf32> to vector<4x256xf32>
    %227 = arith.mulf %223, %226 : vector<4x256xf32>
    %c80 = arith.constant 80 : index
    %c0_130 = arith.constant 0 : index
    %228 = vector.load %arg7[%c80, %c0_130] : memref<108x256xf32, #tpu.memory_space<vmem>>, vector<4x256xf32>
    tpu.vector_store %arg7[%c80, %c0_130], %227 {strides = array<i32>} : memref<108x256xf32, #tpu.memory_space<vmem>>, vector<4x256xf32>,
    %229 = vector.extract_strided_slice %172 {offsets = [0, 16], sizes = [4, 240], strides = [1, 1]} : vector<4x256xf32> to vector<4x240xf32>
    %230 = vector.extract_strided_slice %172 {offsets = [0, 0], sizes = [4, 16], strides = [1, 1]} : vector<4x256xf32> to vector<4x16xf32>
    %231 = tpu.concatenate %229, %230 in 1 : vector<4x240xf32>, vector<4x16xf32> -> vector<4x256xf32>
    %c7_131 = arith.constant 7 : index
    %c0_132 = arith.constant 0 : index
    %c0_133 = arith.constant 0 : index
    %232 = vector.load %arg5[%c7_131, %c0_132, %c0_133] : memref<9x1x256xf32, #tpu.memory_space<vmem>>, vector<1x1x256xf32>
    %233 = vector.shape_cast %232 : vector<1x1x256xf32> to vector<1x256xf32>
    %234 = vector.broadcast %233 : vector<1x256xf32> to vector<4x256xf32>
    %235 = arith.mulf %231, %234 : vector<4x256xf32>
    %c92 = arith.constant 92 : index
    %c0_134 = arith.constant 0 : index
    %236 = vector.load %arg7[%c92, %c0_134] : memref<108x256xf32, #tpu.memory_space<vmem>>, vector<4x256xf32>
    tpu.vector_store %arg7[%c92, %c0_134], %235 {strides = array<i32>} : memref<108x256xf32, #tpu.memory_space<vmem>>, vector<4x256xf32>,
    %237 = vector.extract_strided_slice %172 {offsets = [0, 17], sizes = [4, 239], strides = [1, 1]} : vector<4x256xf32> to vector<4x239xf32>
    %238 = vector.extract_strided_slice %172 {offsets = [0, 0], sizes = [4, 17], strides = [1, 1]} : vector<4x256xf32> to vector<4x17xf32>
    %239 = tpu.concatenate %237, %238 in 1 : vector<4x239xf32>, vector<4x17xf32> -> vector<4x256xf32>
    %c8_135 = arith.constant 8 : index
    %c0_136 = arith.constant 0 : index
    %c0_137 = arith.constant 0 : index
    %240 = vector.load %arg5[%c8_135, %c0_136, %c0_137] : memref<9x1x256xf32, #tpu.memory_space<vmem>>, vector<1x1x256xf32>
    %241 = vector.shape_cast %240 : vector<1x1x256xf32> to vector<1x256xf32>
    %242 = vector.broadcast %241 : vector<1x256xf32> to vector<4x256xf32>
    %243 = arith.mulf %239, %242 : vector<4x256xf32>
    %c104 = arith.constant 104 : index
    %c0_138 = arith.constant 0 : index
    %244 = vector.load %arg7[%c104, %c0_138] : memref<108x256xf32, #tpu.memory_space<vmem>>, vector<4x256xf32>
    tpu.vector_store %arg7[%c104, %c0_138], %243 {strides = array<i32>} : memref<108x256xf32, #tpu.memory_space<vmem>>, vector<4x256xf32>,
    %c2_139 = arith.constant 2 : index
    %c0_140 = arith.constant 0 : index
    %c0_141 = arith.constant 0 : index
    %245 = vector.load %arg2[%c2_139, %c0_140, %c0_141] : memref<3x4x108xf32, #tpu.memory_space<vmem>>, vector<1x4x108xf32>
    %246 = vector.shape_cast %245 : vector<1x4x108xf32> to vector<4x108xf32>
    %c0_142 = arith.constant 0 : index
    %c0_143 = arith.constant 0 : index
    %247 = vector.load %arg7[%c0_142, %c0_143] : memref<108x256xf32, #tpu.memory_space<vmem>>, vector<108x256xf32>
    %cst_144 = arith.constant dense<0.000000e+00> : vector<4x256xf32>
    %248 = tpu.matmul %246, %247, %cst_144 {dimension_numbers = #tpu.dot_dimension_numbers<[1], [0], [0], [1], [0, 0, 1, 1], [], []>} : vector<4x108xf32>, vector<108x256xf32>, vector<4x256xf32> -> vector<4x256xf32>
    %c2_145 = arith.constant 2 : index
    %c0_146 = arith.constant 0 : index
    %c0_147 = arith.constant 0 : index
    %249 = vector.load %arg3[%c2_145, %c0_146, %c0_147] : memref<3x4x1xf32, #tpu.memory_space<vmem>>, vector<1x4x1xf32>
    %250 = vector.shape_cast %249 : vector<1x4x1xf32> to vector<4x1xf32>
    %251 = vector.broadcast %250 : vector<4x1xf32> to vector<4x256xf32>
    %252 = arith.mulf %248, %251 : vector<4x256xf32>
    %c2_148 = arith.constant 2 : index
    %c0_149 = arith.constant 0 : index
    %c0_150 = arith.constant 0 : index
    %253 = vector.load %arg4[%c2_148, %c0_149, %c0_150] : memref<3x4x1xf32, #tpu.memory_space<vmem>>, vector<1x4x1xf32>
    %254 = vector.shape_cast %253 : vector<1x4x1xf32> to vector<4x1xf32>
    %255 = vector.broadcast %254 : vector<4x1xf32> to vector<4x256xf32>
    %256 = arith.addf %252, %255 : vector<4x256xf32>
    %cst_151 = arith.constant 0.000000e+00 : f32
    %257 = vector.broadcast %cst_151 : f32 to vector<4x256xf32>
    %258 = arith.maximumf %256, %257 : vector<4x256xf32>
    %c0_152 = arith.constant 0 : index
    %c8_153 = arith.constant 8 : index
    %c0_154 = arith.constant 0 : index
    %259 = vector.load %arg6[%c0_152, %c8_153, %c0_154] : memref<1x12x256xf32, #tpu.memory_space<vmem>>, vector<1x4x256xf32>
    %260 = vector.shape_cast %259 : vector<1x4x256xf32> to vector<4x256xf32>
    %261 = vector.shape_cast %258 : vector<4x256xf32> to vector<1x4x256xf32>
    tpu.vector_store %arg6[%c0_152, %c8_153, %c0_154], %261 {strides = array<i32>} : memref<1x12x256xf32, #tpu.memory_space<vmem>>, vector<1x4x256xf32>,
    return
  }
  func.func @transform_0(%arg0: i32) -> (i32, i32, i32) {
    %c0_i32 = arith.constant 0 : i32
    %c0_i32_0 = arith.constant 0 : i32
    %c0_i32_1 = arith.constant 0 : i32
    return %arg0, %c0_i32, %c0_i32_0 : i32, i32, i32
  }
  func.func @transform_1(%arg0: i32) -> (i32, i32, i32) {
    %c0_i32 = arith.constant 0 : i32
    %c0_i32_0 = arith.constant 0 : i32
    %c0_i32_1 = arith.constant 0 : i32
    %c0_i32_2 = arith.constant 0 : i32
    return %c0_i32, %c0_i32_0, %c0_i32_1 : i32, i32, i32
  }
  func.func @transform_2(%arg0: i32) -> (i32, i32, i32) {
    %c0_i32 = arith.constant 0 : i32
    %c0_i32_0 = arith.constant 0 : i32
    %c0_i32_1 = arith.constant 0 : i32
    %c0_i32_2 = arith.constant 0 : i32
    return %c0_i32, %c0_i32_0, %c0_i32_1 : i32, i32, i32
  }
  func.func @transform_3(%arg0: i32) -> (i32, i32, i32) {
    %c0_i32 = arith.constant 0 : i32
    %c0_i32_0 = arith.constant 0 : i32
    %c0_i32_1 = arith.constant 0 : i32
    %c0_i32_2 = arith.constant 0 : i32
    return %c0_i32, %c0_i32_0, %c0_i32_1 : i32, i32, i32
  }
  func.func @transform_4(%arg0: i32) -> (i32, i32, i32) {
    %c0_i32 = arith.constant 0 : i32
    %c0_i32_0 = arith.constant 0 : i32
    %c0_i32_1 = arith.constant 0 : i32
    %c0_i32_2 = arith.constant 0 : i32
    return %c0_i32, %c0_i32_0, %c0_i32_1 : i32, i32, i32
  }
  func.func @transform_5(%arg0: i32) -> (i32, i32, i32) {
    %c0_i32 = arith.constant 0 : i32
    %c0_i32_0 = arith.constant 0 : i32
    %c0_i32_1 = arith.constant 0 : i32
    return %arg0, %c0_i32, %c0_i32_0 : i32, i32, i32
  }
}

</mosaic_0001>

<bundles_post_ra>
// kernel: tpu_custom_call.1
= control target key start
LH: loop header
LB: loop body
LE: loop exit
PB: predicated region body
PF: predicated region fallthrough
CT: control target
= control target key end

     0   :  { %10 = vsyncpa [#allocation4], 0  ;;  %s2069_s0 = inlined_call_operand.hbm [shape: f32[2,4,256], index: 0, kind: input, shape index: {}]   ;;  %s2070_s1 = inlined_call_operand.hbm [shape: f32[3,4,108], index: 1, kind: input, shape index: {}]   ;;  %s2071_s2 = inlined_call_operand.vmem [shape: f32[3,4,1], index: 2, kind: input, shape index: {}]   ;;  %s2072_s3 = inlined_call_operand.vmem [shape: f32[3,4,1], index: 3, kind: input, shape index: {}]   ;;  %s2073_s4 = inlined_call_operand.vmem [shape: f32[9,1,256], index: 4, kind: input, shape index: {}]   ;;  %s2074_s5 = inlined_call_operand.vmem [shape: f32[2,12,256], index: 5, kind: output, shape index: {}]  }
   0x1   :  { %12 = vsyncpa [#allocation4 + $0x1], 0 }
   0x2   :  { %13 = vsyncpa [#allocation6], 0  ;;  %s1585_s18 = smov 0   ;;  %s1587_s19 = smov 0  }
   0x3   :  { %s1589_s20 = smov 0   ;;  %s1591_s21 = smov 0  }
   0x4 LB: > { %s171_s24 = sshll.u32 %s2070_s1, 4  ;;  %s1607_s25 = sadd.s32 4294967295, %s1540_s21   ;;  %s1540_s21 = sphi %s1591_s21, %s2081_s21   ;;  %s1536_s20 = sphi %s1589_s20, %s2080_s20   ;;  %s1532_s19 = sphi %s1587_s19, %s2079_s19   ;;  %s1528_s18 = sphi %s1585_s18, %s2078_s18   ;;  %s172_s24 = int_to_ptr.hbm [resolvable:$true] %s171_s24 }
   0x5   : > { %p1322_p0 = scmp.ge.s32.totalorder %s1540_s21, 1  ;;  %p40_p1 = scmp.eq.s32.totalorder %s1607_s25, 0 }
   0x6   : > { %p160_p2 = scmp.lt.s32.totalorder %s1540_s21, 3  ;;  %s1542_s27 = smov [#allocation5]  }
   0x7   : > { %s173_s28 = sshll.u32 %s1542_s27, 4  ;;  %s1543_s29 = smov 64   ;;  %s174_s28 = int_to_ptr.vmem [resolvable:$true] %s173_s28 }
   0x8   : > { %p1612_p3 = pnand %p1322_p0, %p160_p2  ;;  %s1544_s30 = smov 4  }
   0x9   : > { %s1621_s6 = sadd.s32 1, %s1540_s21   ;;  %s26_s8 = sadd.s32 1, %s1536_s20 }
   0xa   : > { %p1383_p4 = pneg %p1612_p3  ;;  %s23_s7 = ssub.s32 %s1540_s21, %s1621_s6 }
   0xb   : > { %p24_p6 = scmp.eq.s32.totalorder %s23_s7, 0  ;;  %p33_p7 = scmp.ne.s32.totalorder %s1536_s20, %s1532_s19 }
   0xc   : > { %p1384_p5 = pnand %p1383_p4, %p40_p1  ;;  %p34_p8 = scmp.eq.s32.totalorder %s1540_s21, 0 }
   0xd   : > { %p39_p9 = scmp.ne.s32.totalorder %s1532_s19, %s1528_s18  ;;  %p1392_p12 = scmp.lt.s32.totalorder %s1540_s21, 2 }
   0xe   : > { %1386 = dma.hbm_to_vmem [thread:$0]  (!%p1384_p5), %s172_s24, 192, %s174_s28, [#allocation6], %s1543_s29, %s1543_s29, %s1544_s30  }
   0xf   : > { %s1631_s9 = scalar_select %p24_p6, %s1536_s20, %s26_s8  }
  0x10   : > { %p35_p10 = por %p34_p8, %p33_p7  ;;  %p1635_p11 = por %p40_p1, %p39_p9 }
  0x11   : > { %s196_s11 = sand.u32 1, %s1536_s20   ;;  %s1375_s13 = sshll.u32 %s1540_s21, 3 }
  0x12   : > { %s1325_s12 = sshll.u32 %s196_s11, 3  ;;  %s205_s16 = scalar_lea.hbm %s2069_s0, %s1375_s13 }
  0x13   : > { %s200_s17 = scalar_lea.vmem [#allocation3], %s1325_s12  ;;  %s207_s23 = sshll.u32 %s205_s16, 4  ;;  %s208_s23 = int_to_ptr.hbm [resolvable:$true] %s207_s23 }
  0x14   : > { %s209_s22 = sshll.u32 %s200_s17, 4  ;;  %p1645_p13 = pnand %p1392_p12, %p35_p10  ;;  %s210_s22 = int_to_ptr.vmem [resolvable:$true] %s209_s22 }
  0x15   : > { %s197_s24 = scalar_lea.sflag [#allocation4], %s196_s11  ;;  %s1472_s27 = sshra.s32 %s208_s23, 4  ;;  %s1473_s27 = int_to_ptr.hbm [resolvable:$true] %s1472_s27 }
  0x16   : > { %s1474_s28 = scalar_lea.hbm %s1473_s27, 8  ;;  %p1476_p2 = pneg %p1645_p13 }
  0x17   : > { %p1475_p0 = scmp.ne.s32.totalorder %s1473_s27, %s1474_s28  ;;  %s1479_s30 = scalar_lea.hbm %s2069_s0, 16 }
  0x18   : > { %p1480_p6 = scmp.lt.s32.totalorder %s1473_s27, %s2069_s0  ;;  %p1481_p7 = scmp.lt.s32.totalorder %s1479_s30, %s1474_s28 }
  0x19   : > { %p1477_p4 = pnand %p1476_p2, %p1475_p0 }
  0x1a   : > { %p1482_p8 = por %p1481_p7, %p1480_p6 }
  0x1b   : > { %p1478_p5 = pneg %p1477_p4 }
  0x1d   : > { %p1483_p9 = pnand %p1482_p8, %p1478_p5 }
  0x1f   : > { %1486 = shalt.err (!%p1483_p9)
}
  0x20   : > { %1390 = dma.hbm_to_vmem [thread:$0]  (!%p1645_p13), %s208_s23, 128, %s210_s22, %s197_s24  }
  0x21   : > { %218 = sbr.rel (%p1612_p3) target bundleno = 1065 (0x429), region = 40  ;;  %s220_s11 = sand.u32 (!%p1612_p3), 1, %s1532_s19  }
  0x22   : > { %s1329_s12 = sshll.u32 (!%p1612_p3), %s220_s11, 3  ;;  %s221_s13 = scalar_lea.sflag (!%p1612_p3), [#allocation4], %s220_s11 }
  0x23   : > { %s224_s14 = scalar_lea.vmem (!%p1612_p3), [#allocation3], %s1329_s12 }
  0x26   : > { %1519 = dma.done.wait (%p1635_p11), %s221_s13, 128  }
  0x27   : > { %1521 = vsyncadd (%p1635_p11), %s221_s13, 4294967168 }
  0x28   : > { %1523 = dma.done.wait (%p40_p1), [#allocation6], 192  }
  0x29   : > { %1525 = vsyncadd (%p40_p1), [#allocation6], 4294967104  ;;  %v1670_v0 = vld [vmem:[%s224_s14] sm:$0xff]  ;;  %vm421_vm0 = vcmask 1043456   ;;  %s1545_s15 = smov 1   ;;  %s1546_s16 = smov 127  }
  0x2a   : > { %292 = vst [vmem:[#allocation1] ss:$2 sm:$0xff] %v1670_v0  ;;  %v1336_v8 = vld [vmem:[%s2073_s4 + $0x8] sm:$0x3]  ;;  %s1547_s17 = smov 113   ;;  %s1548_s22 = smov 112  }
  0x2b   : > { %v419_v11 = vperm.slane %v1336_v8, 1  ;;  %v418_v12 = vperm.slane %v1336_v8, 0  ;;  %s1549_s23 = smov 111   ;;  %s1550_s18 = smov 15   ;;  %v1552_v33 = vmov 0.0   ;;  %vm393_vm1 = vcmask 7168  }
  0x2c   : > { %s1551_s24 = smov 16   ;;  %270 = vst [vmem:[#allocation2 + $0x80] sm:$0xff] %v1552_v33  ;;  %s1553_s27 = smov 17   ;;  %v1335_v34 = vld [vmem:[%s2073_s4 + $0x6] sm:$0x3]  ;;  %vm440_vm2 = vcmask 1039360  }
  0x2d   : > { %v420_v13 = vrot.slane %v419_v11, 4  ;;  %271 = vst [vmem:[#allocation2 + $0x88] sm:$0xff] %v1552_v33  ;;  %v401_v37 = vperm.slane %v1335_v34, 0  ;;  %v402_v38 = vperm.slane %v1335_v34, 1  ;;  %v1337_v47 = vld [vmem:[%s2073_s4 + $0xa] sm:$0x3] }
  0x2e   : > { %262 = vst [vmem:[#allocation2 + $0xb0] sm:$0xff] %v1552_v33  ;;  %v453_v48 = vperm.slane %v1337_v47, 0  ;;  %v454_v49 = vperm.slane %v1337_v47, 1  ;;  %v1338_v60 = vld [vmem:[%s2073_s4 + $0xc] sm:$0x3]  ;;  %vm474_vm3 = vcmask 924672  }
  0x2f   : > { %v422_v15 = vsel %vm421_vm0, %v418_v12, %v420_v13  ;;  %263 = vst [vmem:[#allocation2] sm:$0xff] %v1552_v33  ;;  %v487_v61 = vperm.slane %v1338_v60, 0  ;;  %v488_v62 = vperm.slane %v1338_v60, 1  ;;  %v1339_v63 = vld [vmem:[%s2073_s4 + $0xe] sm:$0x3]  ;;  %vm502_vm4 = vcmask 916480  }
  0x30   : > { %v424_v16 = vmul.f32 %v422_v15, %v1670_v0  ;;  %264 = vst [vmem:[#allocation2 + $0xd8] sm:$0xff] %v1552_v33  ;;  %v515_v11 = vperm.slane %v1339_v63, 0  ;;  %vm536_vm5 = vcmask 908288   ;;  %vm365_vm6 = vcmask 121856   ;;  %v644_v34 = vld [vmem:[%s2072_s3] sm:$0xf] }
  0x31   : > { %v1673_v1 = vld.sshfl [vmem:[#allocation1 + $0x8] sm:$0xff pattern:$0x75316420]  ;;  %265 = vst [vmem:[#allocation2 + $0x18] sm:$0xff] %v1552_v33  ;;  %vm331_vm7 = vcmask 130048   ;;  %vm304_vm8 = vcmask 138240  }
  0x32   : > { %297 = vst [vmem:[#allocation1] ss:$2 sm:$0xff] %v1670_v0  ;;  %vm586_vm9 = vcmask 883712   ;;  %p257_p1 = scmp.lt.s32.totalorder %s1607_s25, 1 }
  0x33   : > { %266 = vst [vmem:[#allocation2 + $0x50] sm:$0xff] %v1552_v33 }
  0x34   : > { %267 = vst [vmem:[#allocation2 + $0x68] sm:$0xff] %v1552_v33  ;;  %s2083_s25 = smov (!%p257_p1, %s1607_s25), 1 }
  0x35   : > { %268 = vst [vmem:[#allocation2 + $0x30] sm:$0xff] %v1552_v33  ;;  %s1376_s26 = sshll.u32 %s2083_s25, 5 }
  0x36   : > { %269 = vst [vmem:[#allocation2 + $0x48] sm:$0xff] %v1552_v33  ;;  %s1865_s21 = scalar_lea.vmem %s2074_s5, %s1376_s26 }
  0x37   : > { %272 = vst [vmem:[#allocation2 + $0x8] sm:$0xff] %v1552_v33 }
  0x38   : > { %273 = vst [vmem:[#allocation2 + $0x58] sm:$0xff] %v1552_v33 }
  0x39   : > { %v1676_v2 = vld.sshfl [vmem:[#allocation1] sm:$0xff pattern:$0x75316420]  ;;  %v1678_v3 = vld.sshfl [vmem:[#allocation1 + $0x8] sm:$0xff pattern:$0x75316420] }
  0x3a   : > { %319 = vst [vmem:[#allocation1] ss:$2 sm:$0xff] %v1670_v0 }
  0x3b   : > { %274 = vst [vmem:[#allocation2 + $0x38] sm:$0xff] %v1552_v33 }
  0x3c   : > { %275 = vst [vmem:[#allocation2 + $0x90] sm:$0xff] %v1552_v33 }
  0x3d   : > { %276 = vst [vmem:[#allocation2 + $0x78] sm:$0xff] %v1552_v33 }
  0x3e   : > { %277 = vst [vmem:[#allocation2 + $0xb8] sm:$0xff] %v1552_v33 }
  0x3f   : > { %278 = vst [vmem:[#allocation2 + $0x40] sm:$0xff] %v1552_v33 }
  0x40   : > { %279 = vst [vmem:[#allocation2 + $0x28] sm:$0xff] %v1552_v33 }
  0x41   : > { %v1681_v4 = vld.sshfl [vmem:[#allocation1 + $0x8] sm:$0xff pattern:$0x75316420]  ;;  %280 = vst [vmem:[#allocation2 + $0xc0] sm:$0xff] %v1552_v33 }
  0x42   : > { %324 = vst [vmem:[#allocation1] ss:$2 sm:$0xff] %v1670_v0 }
  0x43   : > { %281 = vst [vmem:[#allocation2 + $0x60] sm:$0xff] %v1552_v33 }
  0x44   : > { %282 = vst [vmem:[#allocation2 + $0xd0] sm:$0xff] %v1552_v33 }
  0x45   : > { %283 = vst [vmem:[#allocation2 + $0xa8] sm:$0xff] %v1552_v33 }
  0x46   : > { %284 = vst [vmem:[#allocation2 + $0x98] sm:$0xff] %v1552_v33 }
  0x47   : > { %285 = vst [vmem:[#allocation2 + $0xa0] sm:$0xff] %v1552_v33 }
  0x48   : > { %286 = vst [vmem:[#allocation2 + $0x20] sm:$0xff] %v1552_v33 }
  0x49   : > { %v1684_v5 = vld.sshfl [vmem:[#allocation1] sm:$0xff pattern:$0x75316420]  ;;  %v1686_v6 = vld.sshfl [vmem:[#allocation1 + $0x8] sm:$0xff pattern:$0x75316420] }
  0x4a   : > { %353 = vst [vmem:[#allocation1] ss:$2 sm:$0xff] %v1670_v0 }
  0x4b   : > { %287 = vst [vmem:[#allocation2 + $0x10] sm:$0xff] %v1552_v33 }
  0x4c   : > { %288 = vst [vmem:[#allocation2 + $0xc8] sm:$0xf] %v1552_v33 }
  0x4d   : > { %289 = vst [vmem:[#allocation2 + $0x70] sm:$0xf] %v1552_v33 }
  0x51   : > { %v1689_v7 = vld.sshfl [vmem:[#allocation1 + $0x8] sm:$0xff pattern:$0x75316420] }
  0x52   : > { %358 = vst [vmem:[#allocation1] ss:$2 sm:$0xff] %v1670_v0 }
  0x53   : > { %v584_v15 = vld [vmem:[#allocation2 + $0xc8] sm:$0xf] }
  0x54   : > { %1341 = vmatpush.msk.msra.mxu0 %vm421_vm0, %v584_v15 }
  0x59   : > { %v1695_v9 = vld.sshfl [vmem:[#allocation1] sm:$0xff pattern:$0x75316420]  ;;  %v360_v10 = vld.sshfl [vmem:[#allocation1 + $0x8] sm:$0xff pattern:$0x75316420] }
  0x5a   : > { %381 = vst [vmem:[#allocation1] ss:$2 sm:$0xff] %v1670_v0 }
  0x61   : > { %v382_v14 = vld.sshfl [vmem:[#allocation1 + $0x8] sm:$0xff pattern:$0x75316420] }
  0x62   : > { %383 = vrot.lane.b32.xlu0 %v382_v14, %s1545_s15  ;;  %386 = vst [vmem:[#allocation1] ss:$2 sm:$0xff] %v1670_v0 }
  0x69   : > { %v387_v17 = vld.sshfl [vmem:[#allocation1] sm:$0xff pattern:$0x75316420]  ;;  %v388_v18 = vld.sshfl [vmem:[#allocation1 + $0x8] sm:$0xff pattern:$0x75316420] }
  0x6a   : > { %389 = vrot.lane.b32.xlu1 %v387_v17, %s1545_s15  ;;  %426 = vst [vmem:[#allocation1] ss:$2 sm:$0xff] %v424_v16  ;;  %391 = vrot.lane.b32.xlu2 %v388_v18, %s1545_s15  ;;  %v585_v16 = vld [vmem:[#allocation2 + $0x70] sm:$0xf] }
  0x6b   : > { %1343 = vmatpush.msk.msra.mxu1 %vm421_vm0, %v585_v16  ;;  %v557_v16 = vld [vmem:[#allocation5] sm:$0xf] }
  0x71   : > { %v1704_v19 = vld.sshfl [vmem:[#allocation1] sm:$0xff pattern:$0x75316420]  ;;  %v1706_v20 = vld.sshfl [vmem:[#allocation1 + $0x8] sm:$0xff pattern:$0x75316420] }
  0x72   : > { %433 = vst [vmem:[#allocation1] ss:$2 sm:$0xff] %v1670_v0 }
  0x73   : > { %431 = vst [vmem:[#allocation2 + $0x38] sm:$0xf] %v1704_v19  ;;  %v1340_v19 = vld [vmem:[%s2073_s4 + $0x10] sm:$0x3] }
  0x74   : > { %432 = vst [vmem:[#allocation2 + $0x90] sm:$0xf] %v1706_v20  ;;  %v549_v20 = vperm.slane %v1340_v19, 0 }
  0x79   : > { %v435_v21 = vld.sshfl [vmem:[#allocation1 + $0x8] sm:$0xff pattern:$0x75316420]  ;;  %v434_v22 = vld.sshfl [vmem:[#allocation1] sm:$0xff pattern:$0x75316420] }
  0x7a   : > { %438 = vrot.lane.b32.xlu1 %v435_v21, %s1546_s16  ;;  %436 = vrot.lane.b32.xlu0 %v434_v22, %s1546_s16  ;;  %444 = vst [vmem:[#allocation1] ss:$2 sm:$0xff] %v1670_v0  ;;  %v550_v21 = vperm.slane %v1340_v19, 1 }
  0x81   : > { %v445_v23 = vld.sshfl [vmem:[#allocation1] sm:$0xff pattern:$0x75316420] }
  0x82   : > { %467 = vst [vmem:[#allocation1] ss:$2 sm:$0xff] %v1670_v0  ;;  %446 = vrot.lane.b32.xlu2 %v445_v23, %s1546_s16 }
  0x89   : > { %v469_v24 = vld.sshfl [vmem:[#allocation1 + $0x8] sm:$0xff pattern:$0x75316420]  ;;  %v468_v25 = vld.sshfl [vmem:[#allocation1] sm:$0xff pattern:$0x75316420] }
  0x8a   : > { %472 = vrot.lane.b32.xlu1 %v469_v24, %s1547_s17  ;;  %470 = vrot.lane.b32.xlu0 %v468_v25, %s1547_s17  ;;  %478 = vst [vmem:[#allocation1] ss:$2 sm:$0xff] %v1670_v0 }
  0x91   : > { %v479_v26 = vld.sshfl [vmem:[#allocation1] sm:$0xff pattern:$0x75316420] }
  0x92   : > { %495 = vst [vmem:[#allocation1] ss:$2 sm:$0xff] %v1670_v0  ;;  %480 = vrot.lane.b32.xlu2 %v479_v26, %s1547_s17 }
  0x99   : > { %v497_v27 = vld.sshfl [vmem:[#allocation1 + $0x8] sm:$0xff pattern:$0x75316420]  ;;  %v496_v28 = vld.sshfl [vmem:[#allocation1] sm:$0xff pattern:$0x75316420] }
  0x9a   : > { %498 = vrot.lane.b32.xlu1 %v496_v28, %s1548_s22  ;;  %506 = vst [vmem:[#allocation1] ss:$2 sm:$0xff] %v1670_v0  ;;  %500 = vrot.lane.b32.xlu2 %v497_v27, %s1548_s22 }
  0xa1   : > { %v507_v29 = vld.sshfl [vmem:[#allocation1] sm:$0xff pattern:$0x75316420] }
  0xa2   : > { %529 = vst [vmem:[#allocation1] ss:$2 sm:$0xff] %v1670_v0  ;;  %508 = vrot.lane.b32.xlu2 %v507_v29, %s1548_s22  ;;  %v1334_v29 = vld [vmem:[%s2073_s4 + $0x4] sm:$0x3] }
  0xa9   : > { %v530_v30 = vld.sshfl [vmem:[#allocation1] sm:$0xff pattern:$0x75316420]  ;;  %v531_v31 = vld.sshfl [vmem:[#allocation1 + $0x8] sm:$0xff pattern:$0x75316420] }
  0xaa   : > { %532 = vrot.lane.b32.xlu0 %v530_v30, %s1549_s23  ;;  %540 = vst [vmem:[#allocation1] ss:$2 sm:$0xff] %v1670_v0  ;;  %363 = vrot.lane.b32.xlu2 %v360_v10, %s1550_s18  ;;  %v373_v30 = vperm.slane %v1334_v29, 0 }
  0xb1   : > { %v541_v32 = vld.sshfl [vmem:[#allocation1] sm:$0xff pattern:$0x75316420] }
  0xb2   : > { %534 = vrot.lane.b32.xlu0 %v531_v31, %s1549_s23  ;;  %542 = vrot.lane.b32.xlu1 %v541_v32, %s1549_s23  ;;  %v374_v31 = vperm.slane %v1334_v29, 1  ;;  %v636_v32 = vld [vmem:[%s2071_s2] sm:$0xf] }
  0xb3   : > { %329 = vrot.lane.b32.xlu2 %v1686_v6, %s1551_s24 }
  0xba   : > { %355 = vrot.lane.b32.xlu0 %v1689_v7, %s1550_s18  ;;  %361 = vrot.lane.b32.xlu1 %v1695_v9, %s1550_s18 }
  0xbb   : > { %302 = vrot.lane.b32.xlu2 %v1678_v3, %s1553_s27 }
  0xc2   : > { %321 = vrot.lane.b32.xlu0 %v1681_v4, %s1551_s24  ;;  %327 = vrot.lane.b32.xlu1 %v1684_v5, %s1551_s24 }
  0xc4   : > { %v392_v35 = vpop.permute.xlu2 %391 }
  0xca   : > { %294 = vrot.lane.b32.xlu0 %v1673_v1, %s1553_s27  ;;  %300 = vrot.lane.b32.xlu1 %v1676_v2, %s1553_s27  ;;  %v516_v2 = vperm.slane %v1339_v63, 1  ;;  %v570_v63 = vld [vmem:[#allocation2 + $0x38] sm:$0xff] }
  0xd4   : > { %v384_v36 = vpop.permute.xlu0 %383 }
  0xdc   : > { %v390_v39 = vpop.permute.xlu1 %389  ;;  %v447_v46 = vpop.permute.xlu2 %446 }
  0xdd   : > { %v394_v40 = vsel %vm393_vm1, %v390_v39, %v392_v35  ;;  %v397_v41 = vsel %vm393_vm1, %v384_v36, %v390_v39  ;;  %v1554_v35 = vmov 0  }
  0xde   : > { %v405_v42 = vmul.f32 %v401_v37, %v397_v41  ;;  %v406_v43 = vmul.f32 %v402_v38, %v394_v40  ;;  %1439 = vset.pattern.permute.xlu0 %v1554_v35  ;;  %1440 = vset.pattern.permute.xlu1 %v1554_v35 }
  0xdf   : > { %639 = vperm.xlu0 %1439, %v636_v32   ;;  %647 = vperm.xlu1 %1440, %v644_v34  }
  0xe0   : > { %v409_v44 = vrot.slane %v405_v42, 4  ;;  %v410_v45 = vrot.slane %v406_v43, 4  ;;  %1441 = vset.pattern.permute.xlu2 %v1554_v35  ;;  %v1333_v43 = vld [vmem:[%s2073_s4 + $0x2] sm:$0x3] }
  0xe1   : > { %v340_v47 = vperm.slane %v1333_v43, 1 }
  0xe2   : > { %413 = vst [vmem:[#allocation2 + $0x80] sm:$0xf0] %v409_v44 }
  0xe3   : > { %414 = vst [vmem:[#allocation2 + $0x88] sm:$0xf0] %v410_v45 }
  0xec   : > { %v439_v50 = vpop.permute.xlu1 %438  ;;  %v437_v51 = vpop.permute.xlu0 %436 }
  0xed   : > { %v441_v52 = vsel %vm440_vm2, %v437_v51, %v439_v50  ;;  %v449_v53 = vsel %vm440_vm2, %v439_v50, %v447_v46  ;;  %v481_v54 = vpop.permute.xlu2 %480  ;;  %v339_v46 = vperm.slane %v1333_v43, 0 }
  0xee   : > { %v457_v55 = vmul.f32 %v453_v48, %v441_v52  ;;  %v458_v56 = vmul.f32 %v454_v49, %v449_v53 }
  0xf0   : > { %v461_v57 = vrot.slane %v457_v55, 4  ;;  %v462_v58 = vrot.slane %v458_v56, 4 }
  0xf2   : > { %465 = vst [vmem:[#allocation2 + $0x78] sm:$0xf0] %v461_v57 }
  0xf3   : > { %466 = vst [vmem:[#allocation2 + $0xb8] sm:$0xf0] %v462_v58  ;;  %v309_v58 = vld [vmem:[%s2073_s4] sm:$0x3] }
  0xf5   : > { %v501_v59 = vpop.permute.xlu2 %500 }
  0xfc   : > { %v473_v0 = vpop.permute.xlu1 %472  ;;  %v471_v1 = vpop.permute.xlu0 %470 }
  0xfd   : > { %v475_v3 = vsel %vm474_vm3, %v471_v1, %v473_v0  ;;  %v483_v4 = vsel %vm474_vm3, %v473_v0, %v481_v54  ;;  %v509_v5 = vpop.permute.xlu2 %508  ;;  %v311_v1 = vperm.slane %v309_v58, 0 }
  0xfe   : > { %v491_v6 = vmul.f32 %v487_v61, %v475_v3  ;;  %v492_v7 = vmul.f32 %v488_v62, %v483_v4  ;;  %v511_v8 = vsel %vm502_vm4, %v501_v59, %v509_v5  ;;  %v1831_v61 = vld [vmem:[#allocation2 + $0x78] sm:$0xff]  ;;  %v571_v3 = vld [vmem:[#allocation2 + $0x90] sm:$0xff] }
  0xff   : > { %v520_v9 = vmul.f32 %v516_v2, %v511_v8  ;;  %v1833_v62 = vld [vmem:[#allocation2 + $0xb8] sm:$0xff]  ;;  %v312_v2 = vperm.slane %v309_v58, 1 }
 0x100   : > { %493 = vst [vmem:[#allocation2 + $0xc0] sm:$0xf] %v491_v6 }
 0x101   : > { %494 = vst [vmem:[#allocation2 + $0x60] sm:$0xf] %v492_v7  ;;  %v524_v10 = vrot.slane %v520_v9, 4 }
 0x103   : > { %528 = vst [vmem:[#allocation2 + $0xa8] sm:$0xf0] %v524_v10  ;;  %v1841_v10 = vld [vmem:[#allocation2 + $0x80] sm:$0xff] }
 0x105   : > { %v364_v28 = vpop.permute.xlu2 %363 }
 0x107   : > { %v576_v54 = vld [vmem:[#allocation2 + $0xc0] sm:$0xff] }
 0x108   : > { %v577_v57 = vld [vmem:[#allocation2 + $0x60] sm:$0xff] }
 0x10a   : > { %v1821_v51 = vld [vmem:[#allocation2 + $0xa8] sm:$0xff] }
 0x10c   : > { %v499_v12 = vpop.permute.xlu1 %498 }
 0x10d   : > { %v503_v13 = vsel %vm502_vm4, %v499_v12, %v501_v59  ;;  %v330_v45 = vpop.permute.xlu2 %329 }
 0x10e   : > { %v519_v14 = vmul.f32 %v515_v11, %v503_v13  ;;  %v1844_v11 = vld [vmem:[#allocation2 + $0x88] sm:$0xff] }
 0x110   : > { %v523_v17 = vrot.slane %v519_v14, 4 }
 0x112   : > { %527 = vst [vmem:[#allocation2 + $0xd0] sm:$0xf0] %v523_v17 }
 0x115   : > { %v303_v0 = vpop.permute.xlu2 %302 }
 0x119   : > { %v1818_v48 = vld [vmem:[#allocation2 + $0xd0] sm:$0xff] }
 0x11c   : > { %v533_v18 = vpop.permute.xlu0 %532 }
 0x124   : > { %v535_v22 = vpop.permute.xlu0 %534  ;;  %v543_v23 = vpop.permute.xlu1 %542 }
 0x125   : > { %v537_v24 = vsel %vm536_vm5, %v533_v18, %v535_v22  ;;  %v545_v25 = vsel %vm536_vm5, %v535_v22, %v543_v23 }
 0x126   : > { %v553_v26 = vmul.f32 %v549_v20, %v537_v24  ;;  %v554_v27 = vmul.f32 %v550_v21, %v545_v25  ;;  %v1348_v21 = vld [vmem:[%s2073_s4 + $0x8] sm:$0x3] }
 0x128   : > { %555 = vst [vmem:[#allocation2 + $0x20] sm:$0xf] %v553_v26  ;;  %v748_v26 = vperm.slane %v1348_v21, 0 }
 0x129   : > { %556 = vst [vmem:[#allocation2 + $0x10] sm:$0xf] %v554_v27 }
 0x12c   : > { %v356_v36 = vpop.permute.xlu0 %355  ;;  %v362_v37 = vpop.permute.xlu1 %361 }
 0x12d   : > { %v366_v38 = vsel %vm365_vm6, %v362_v37, %v364_v28  ;;  %v369_v39 = vsel %vm365_vm6, %v356_v36, %v362_v37  ;;  %v749_v28 = vperm.slane %v1348_v21, 1  ;;  %v1357_v36 = vld [vmem:[%s2071_s2 + $0x4] sm:$0xf] }
 0x12e   : > { %v377_v40 = vmul.f32 %v373_v30, %v369_v39  ;;  %v378_v41 = vmul.f32 %v374_v31, %v366_v38  ;;  %v878_v39 = vld [vmem:[#allocation2 + $0xc8] sm:$0xf] }
 0x12f   : > { %v582_v42 = vld [vmem:[#allocation2 + $0x20] sm:$0xff]  ;;  %1353 = vmatpush.msk.msra.mxu2 %vm421_vm0, %v878_v39 }
 0x130   : > { %379 = vst [vmem:[#allocation2 + $0x30] sm:$0xf] %v377_v40  ;;  %599 = vmatpush.msra.mxu0 %v582_v42  ;;  %v583_v44 = vld [vmem:[#allocation2 + $0x10] sm:$0xff]  ;;  %v1350_v42 = vld [vmem:[%s2073_s4 + $0xc] sm:$0x3] }
 0x131   : > { %380 = vst [vmem:[#allocation2 + $0x48] sm:$0xf] %v378_v41  ;;  %619 = vmatpush.msra.mxu1 %v583_v44  ;;  %v879_v40 = vld [vmem:[#allocation2 + $0x70] sm:$0xf]  ;;  %v792_v43 = vperm.slane %v1350_v42, 0  ;;  %v793_v44 = vperm.slane %v1350_v42, 1 }
 0x132   : > { %600 = vmatpush.msra.mxu0 %v1552_v33  ;;  %1355 = vmatpush.msk.msra.mxu3 %vm421_vm0, %v879_v40 }
 0x133   : > { %620 = vmatpush.msra.mxu1 %v1552_v33 }
 0x134   : > { %v322_v49 = vpop.permute.xlu0 %321  ;;  %v328_v50 = vpop.permute.xlu1 %327  ;;  %601 = vmatpush.msra.mxu0 %v1818_v48 }
 0x135   : > { %v332_v52 = vsel %vm331_vm7, %v328_v50, %v330_v45  ;;  %v335_v53 = vsel %vm331_vm7, %v322_v49, %v328_v50  ;;  %621 = vmatpush.msra.mxu1 %v1821_v51 }
 0x136   : > { %v343_v55 = vmul.f32 %v339_v46, %v335_v53  ;;  %v344_v56 = vmul.f32 %v340_v47, %v332_v52  ;;  %602 = vmatpush.msra.mxu0 %v576_v54  ;;  %v1351_v53 = vld [vmem:[%s2073_s4 + $0xe] sm:$0x3]  ;;  %v1352_v54 = vld [vmem:[%s2073_s4 + $0x10] sm:$0x3] }
 0x137   : > { %622 = vmatpush.msra.mxu1 %v577_v57  ;;  %v564_v12 = vld [vmem:[#allocation2 + $0x30] sm:$0xff]  ;;  %v817_v58 = vperm.slane %v1351_v53, 0 }
 0x138   : > { %v347_v59 = vrot.slane %v343_v55, 4  ;;  %v348_v60 = vrot.slane %v344_v56, 4  ;;  %603 = vmatpush.msra.mxu0 %v1552_v33  ;;  %v565_v13 = vld [vmem:[#allocation2 + $0x48] sm:$0xff] }
 0x139   : > { %623 = vmatpush.msra.mxu1 %v1552_v33 }
 0x13a   : > { %351 = vst [vmem:[#allocation2 + $0xd8] sm:$0xf0] %v347_v59  ;;  %604 = vmatpush.msra.mxu0 %v1831_v61  ;;  %v818_v59 = vperm.slane %v1351_v53, 1 }
 0x13b   : > { %352 = vst [vmem:[#allocation2 + $0x18] sm:$0xf0] %v348_v60  ;;  %624 = vmatpush.msra.mxu1 %v1833_v62  ;;  %v836_v60 = vperm.slane %v1352_v54, 0 }
 0x13c   : > { %v295_v4 = vpop.permute.xlu0 %294  ;;  %v301_v5 = vpop.permute.xlu1 %300  ;;  %605 = vmatpush.msra.mxu0 %v570_v63  ;;  %v837_v63 = vperm.slane %v1352_v54, 1 }
 0x13d   : > { %v305_v6 = vsel %vm304_vm8, %v301_v5, %v303_v0  ;;  %v308_v7 = vsel %vm304_vm8, %v295_v4, %v301_v5  ;;  %625 = vmatpush.msra.mxu1 %v571_v3 }
 0x13e   : > { %v315_v8 = vmul.f32 %v311_v1, %v308_v7  ;;  %v316_v9 = vmul.f32 %v312_v2, %v305_v6  ;;  %606 = vmatpush.msra.mxu0 %v1552_v33 }
 0x13f   : > { %626 = vmatpush.msra.mxu1 %v1552_v33 }
 0x140   : > { %317 = vst [vmem:[#allocation2 + $0xb0] sm:$0xf] %v315_v8  ;;  %607 = vmatpush.msra.mxu0 %v1841_v10 }
 0x141   : > { %318 = vst [vmem:[#allocation2] sm:$0xf] %v316_v9  ;;  %627 = vmatpush.msra.mxu1 %v1844_v11  ;;  %v1849_v14 = vld [vmem:[#allocation2 + $0xd8] sm:$0xff] }
 0x142   : > { %608 = vmatpush.msra.mxu0 %v564_v12  ;;  %v1852_v15 = vld [vmem:[#allocation2 + $0x18] sm:$0xff] }
 0x143   : > { %628 = vmatpush.msra.mxu1 %v565_v13  ;;  %v1347_v12 = vld [vmem:[%s2073_s4 + $0x6] sm:$0x3]  ;;  %v1349_v13 = vld [vmem:[%s2073_s4 + $0xa] sm:$0x3] }
 0x144   : > { %609 = vmatpush.msra.mxu0 %v1552_v33  ;;  %v774_v21 = vperm.slane %v1349_v13, 1 }
 0x145   : > { %629 = vmatpush.msra.mxu1 %v1552_v33 }
 0x146   : > { %610 = vmatpush.msra.mxu0 %v1849_v14 }
 0x147   : > { %630 = vmatpush.msra.mxu1 %v1852_v15  ;;  %v558_v17 = vld [vmem:[#allocation2 + $0xb0] sm:$0xff] }
 0x148   : > { %611 = vmatpush.msra.mxu0 %v558_v17  ;;  %v559_v18 = vld [vmem:[#allocation2] sm:$0xff] }
 0x149   : > { %631 = vmatpush.msra.mxu1 %v559_v18  ;;  %1342 = vmatmul.msk.f32.vlgmr.msra.gmra.mxu0 %vm586_vm9, %v557_v16  ;;  %v738_v18 = vperm.slane %v1347_v12, 0 }
 0x14a   : > { %1344 = vmatmul.msk.f32.vlgmr.msra.gmra.mxu1 %vm586_vm9, %v557_v16 }
 0x151   : > { %v640_v33 = vpop.permute.xlu0 %639  ;;  %v648_v20 = vpop.permute.xlu1 %647 }
 0x1c6   : > { %v613_v19 = vpop.f32.mrf.mxu0 }
 0x1c7   : > { %v642_v22 = vmul.f32 %v640_v33, %v613_v19  ;;  %v633_v23 = vpop.f32.mrf.mxu1  ;;  %v773_v19 = vperm.slane %v1349_v13, 0 }
 0x1c8   : > { %v643_v24 = vmul.f32 %v640_v33, %v633_v23  ;;  %v739_v33 = vperm.slane %v1347_v12, 1 }
 0x1c9   : > { %v650_v25 = vadd.f32 %v648_v20, %v642_v22 }
 0x1ca   : > { %v651_v27 = vadd.f32 %v648_v20, %v643_v24 }
 0x1cb   : > { %v652_v29 = vmax.f32 %v650_v25, 0.0 }
 0x1cc   : > { %v653_v30 = vmax.f32 %v651_v27, 0.0 }
 0x1cd   : > { %762 = vrot.lane.b32.xlu0 %v652_v29, %s1546_s16  ;;  %781 = vrot.lane.b32.xlu1 %v652_v29, %s1547_s17  ;;  %v752_v31 = vmul.f32 %v748_v26, %v652_v29  ;;  %654 = vst [vmem:[%s1865_s21] sm:$0xf] %v652_v29 }
 0x1ce   : > { %825 = vrot.lane.b32.xlu2 %v652_v29, %s1549_s23  ;;  %v753_v32 = vmul.f32 %v749_v28, %v653_v30  ;;  %655 = vst [vmem:[%s1865_s21 + $0x8] sm:$0xf] %v653_v30 }
 0x1cf   : > { %v756_v34 = vrot.slane %v752_v31, 4  ;;  %v1358_v31 = vld [vmem:[%s2072_s3 + $0x4] sm:$0xf] }
 0x1d0   : > { %v757_v35 = vrot.slane %v753_v32, 4 }
 0x1d1   : > { %760 = vst [vmem:[#allocation2 + $0x38] sm:$0xf0] %v756_v34  ;;  %v1346_v34 = vld [vmem:[%s2073_s4 + $0x4] sm:$0x3] }
 0x1d2   : > { %761 = vst [vmem:[#allocation2 + $0x90] sm:$0xf0] %v757_v35 }
 0x1d5   : > { %808 = vrot.lane.b32.xlu0 %v653_v30, %s1548_s22  ;;  %827 = vrot.lane.b32.xlu1 %v653_v30, %s1549_s23 }
 0x1d6   : > { %806 = vrot.lane.b32.xlu2 %v652_v29, %s1548_s22 }
 0x1dd   : > { %730 = vrot.lane.b32.xlu0 %v652_v29, %s1545_s15  ;;  %764 = vrot.lane.b32.xlu1 %v653_v30, %s1546_s16 }
 0x1de   : > { %783 = vrot.lane.b32.xlu2 %v653_v30, %s1547_s17 }
 0x1e5   : > { %683 = vrot.lane.b32.xlu0 %v653_v30, %s1551_s24  ;;  %702 = vrot.lane.b32.xlu1 %v653_v30, %s1550_s18 }
 0x1e6   : > { %705 = vrot.lane.b32.xlu2 %v652_v29, %s1550_s18 }
 0x1ed   : > { %661 = vrot.lane.b32.xlu0 %v652_v29, %s1553_s27  ;;  %686 = vrot.lane.b32.xlu1 %v652_v29, %s1551_s24 }
 0x1ee   : > { %727 = vrot.lane.b32.xlu2 %v653_v30, %s1545_s15 }
 0x1f5   : > { %933 = vperm.xlu1 %1440, %v1357_v36  }
 0x1f6   : > { %657 = vrot.lane.b32.xlu2 %v653_v30, %s1553_s27 }
 0x1fe   : > { %942 = vperm.xlu2 %1441, %v1358_v31  }
 0x228   : > { %v826_v37 = vpop.permute.xlu2 %825 }
 0x230   : > { %v807_v38 = vpop.permute.xlu2 %806 }
 0x238   : > { %v784_v41 = vpop.permute.xlu2 %783 }
 0x23f   : > { %v763_v45 = vpop.permute.xlu0 %762  ;;  %v782_v46 = vpop.permute.xlu1 %781 }
 0x240   : > { %v785_v47 = vsel %vm474_vm3, %v782_v46, %v784_v41  ;;  %v789_v49 = vsel %vm474_vm3, %v784_v41, %v782_v46  ;;  %v706_v57 = vpop.permute.xlu2 %705 }
 0x241   : > { %v796_v50 = vmul.f32 %v792_v43, %v785_v47  ;;  %v797_v52 = vmul.f32 %v793_v44, %v789_v49  ;;  %v667_v47 = vld [vmem:[%s2073_s4] sm:$0x3] }
 0x243   : > { %v800_v55 = vrot.slane %v796_v50, 4  ;;  %v801_v56 = vrot.slane %v797_v52, 4  ;;  %v1345_v50 = vld [vmem:[%s2073_s4 + $0x2] sm:$0x3] }
 0x245   : > { %804 = vst [vmem:[#allocation2 + $0xc0] sm:$0xf0] %v800_v55  ;;  %v669_v55 = vperm.slane %v667_v47, 0 }
 0x246   : > { %805 = vst [vmem:[#allocation2 + $0x60] sm:$0xf0] %v801_v56 }
 0x247   : > { %v809_v0 = vpop.permute.xlu0 %808  ;;  %v828_v1 = vpop.permute.xlu1 %827 }
 0x248   : > { %v810_v2 = vsel %vm502_vm4, %v807_v38, %v809_v0  ;;  %v814_v3 = vsel %vm502_vm4, %v809_v0, %v807_v38  ;;  %v829_v4 = vsel %vm536_vm5, %v826_v37, %v828_v1  ;;  %v833_v5 = vsel %vm536_vm5, %v828_v1, %v826_v37  ;;  %v728_v20 = vpop.permute.xlu2 %727 }
 0x249   : > { %v821_v6 = vmul.f32 %v817_v58, %v810_v2  ;;  %v822_v7 = vmul.f32 %v818_v59, %v814_v3  ;;  %v840_v8 = vmul.f32 %v836_v60, %v829_v4  ;;  %v841_v9 = vmul.f32 %v837_v63, %v833_v5  ;;  %v1949_v4 = vld [vmem:[#allocation2 + $0x38] sm:$0xff] }
 0x24a   : > { %v713_v37 = vperm.slane %v1346_v34, 0  ;;  %v714_v38 = vperm.slane %v1346_v34, 1  ;;  %v695_v58 = vperm.slane %v1345_v50, 1 }
 0x24b   : > { %823 = vst [vmem:[#allocation2 + $0x98] sm:$0xf] %v821_v6  ;;  %v844_v16 = vrot.slane %v840_v8, 4  ;;  %v845_v17 = vrot.slane %v841_v9, 4  ;;  %v1952_v9 = vld [vmem:[#allocation2 + $0x90] sm:$0xff] }
 0x24c   : > { %824 = vst [vmem:[#allocation2 + $0xa0] sm:$0xf] %v822_v7  ;;  %v1934_v49 = vld [vmem:[#allocation2 + $0xc0] sm:$0xff] }
 0x24d   : > { %848 = vst [vmem:[#allocation2 + $0x20] sm:$0xf0] %v844_v16  ;;  %v1940_v54 = vld [vmem:[#allocation2 + $0x60] sm:$0xff] }
 0x24e   : > { %849 = vst [vmem:[#allocation2 + $0x10] sm:$0xf0] %v845_v17 }
 0x24f   : > { %v731_v22 = vpop.permute.xlu0 %730  ;;  %v765_v23 = vpop.permute.xlu1 %764 }
 0x250   : > { %v732_v24 = vsel %vm393_vm1, %v731_v22, %v728_v20  ;;  %v735_v25 = vsel %vm393_vm1, %v728_v20, %v731_v22  ;;  %v766_v26 = vsel %vm440_vm2, %v763_v45, %v765_v23  ;;  %v770_v27 = vsel %vm440_vm2, %v765_v23, %v763_v45  ;;  %v658_v59 = vpop.permute.xlu2 %657 }
 0x251   : > { %v742_v28 = vmul.f32 %v738_v18, %v735_v25  ;;  %v743_v29 = vmul.f32 %v739_v33, %v732_v24  ;;  %v777_v30 = vmul.f32 %v773_v19, %v766_v26  ;;  %v778_v32 = vmul.f32 %v774_v21, %v770_v27  ;;  %v851_v19 = vld [vmem:[#allocation5 + $0x4] sm:$0xf] }
 0x252   : > { %v874_v39 = vld [vmem:[#allocation2 + $0x98] sm:$0xff] }
 0x253   : > { %744 = vst [vmem:[#allocation2 + $0x8] sm:$0xf] %v742_v28  ;;  %v875_v42 = vld [vmem:[#allocation2 + $0xa0] sm:$0xff] }
 0x254   : > { %745 = vst [vmem:[#allocation2 + $0x58] sm:$0xf] %v743_v29  ;;  %v1921_v35 = vld [vmem:[#allocation2 + $0x20] sm:$0xff] }
 0x255   : > { %779 = vst [vmem:[#allocation2 + $0x40] sm:$0xf] %v777_v30  ;;  %892 = vmatpush.msra.mxu2 %v1921_v35  ;;  %v1924_v36 = vld [vmem:[#allocation2 + $0x10] sm:$0xff] }
 0x256   : > { %780 = vst [vmem:[#allocation2 + $0x28] sm:$0xf] %v778_v32  ;;  %912 = vmatpush.msra.mxu3 %v1924_v36 }
 0x257   : > { %v684_v40 = vpop.permute.xlu0 %683  ;;  %v703_v41 = vpop.permute.xlu1 %702  ;;  %893 = vmatpush.msra.mxu2 %v874_v39  ;;  %v1371_v39 = vld [vmem:[%s2071_s2 + $0x8] sm:$0xf] }
 0x258   : > { %v707_v43 = vsel %vm365_vm6, %v706_v57, %v703_v41  ;;  %v710_v44 = vsel %vm365_vm6, %v703_v41, %v706_v57  ;;  %913 = vmatpush.msra.mxu3 %v875_v42  ;;  %v694_v57 = vperm.slane %v1345_v50, 0  ;;  %v943_v22 = vpop.permute.xlu2 %942  ;;  %v1366_v41 = vld [vmem:[%s2073_s4 + $0x10] sm:$0x3] }
 0x259   : > { %v717_v45 = vmul.f32 %v713_v37, %v710_v44  ;;  %v718_v46 = vmul.f32 %v714_v38, %v707_v43  ;;  %894 = vmatpush.msra.mxu2 %v1818_v48  ;;  %v1372_v38 = vld [vmem:[%s2072_s3 + $0x8] sm:$0xf]  ;;  %v1135_v42 = vperm.slane %v1366_v41, 0  ;;  %v1136_v43 = vperm.slane %v1366_v41, 1 }
 0x25a   : > { %914 = vmatpush.msra.mxu3 %v1821_v51  ;;  %v670_v51 = vperm.slane %v667_v47, 1 }
 0x25b   : > { %v721_v52 = vrot.slane %v717_v45, 4  ;;  %v722_v53 = vrot.slane %v718_v46, 4  ;;  %895 = vmatpush.msra.mxu2 %v1934_v49  ;;  %v863_v16 = vld [vmem:[#allocation2 + $0x58] sm:$0xff] }
 0x25c   : > { %915 = vmatpush.msra.mxu3 %v1940_v54  ;;  %v868_v48 = vld [vmem:[#allocation2 + $0x40] sm:$0xff] }
 0x25d   : > { %725 = vst [vmem:[#allocation2 + $0x30] sm:$0xf0] %v721_v52  ;;  %896 = vmatpush.msra.mxu2 %v868_v48  ;;  %v869_v56 = vld [vmem:[#allocation2 + $0x28] sm:$0xff]  ;;  %v1364_v48 = vld [vmem:[%s2073_s4 + $0xc] sm:$0x3] }
 0x25e   : > { %726 = vst [vmem:[#allocation2 + $0x48] sm:$0xf0] %v722_v53  ;;  %916 = vmatpush.msra.mxu3 %v869_v56  ;;  %v1365_v53 = vld [vmem:[%s2073_s4 + $0xe] sm:$0x3] }
 0x25f   : > { %v662_v60 = vpop.permute.xlu0 %661  ;;  %v687_v63 = vpop.permute.xlu1 %686  ;;  %897 = vmatpush.msra.mxu2 %v1831_v61  ;;  %v862_v61 = vld [vmem:[#allocation2 + $0x8] sm:$0xff]  ;;  %v1110_v56 = vperm.slane %v1365_v53, 0 }
 0x260   : > { %v663_v0 = vsel %vm304_vm8, %v662_v60, %v658_v59  ;;  %v666_v1 = vsel %vm304_vm8, %v658_v59, %v662_v60  ;;  %v688_v2 = vsel %vm331_vm7, %v687_v63, %v684_v40  ;;  %v691_v3 = vsel %vm331_vm7, %v684_v40, %v687_v63  ;;  %917 = vmatpush.msra.mxu3 %v1833_v62 }
 0x261   : > { %v673_v5 = vmul.f32 %v669_v55, %v666_v1  ;;  %v674_v6 = vmul.f32 %v670_v51, %v663_v0  ;;  %v698_v7 = vmul.f32 %v694_v57, %v691_v3  ;;  %v699_v8 = vmul.f32 %v695_v58, %v688_v2  ;;  %898 = vmatpush.msra.mxu2 %v1949_v4 }
 0x262   : > { %918 = vmatpush.msra.mxu3 %v1952_v9  ;;  %v1111_v51 = vperm.slane %v1365_v53, 1  ;;  %v1091_v57 = vperm.slane %v1364_v48, 0  ;;  %v1092_v58 = vperm.slane %v1364_v48, 1  ;;  %v1359_v53 = vld [vmem:[%s2073_s4 + $0x2] sm:$0x3] }
 0x263   : > { %v677_v12 = vrot.slane %v673_v5, 4  ;;  %v678_v13 = vrot.slane %v674_v6, 4  ;;  %700 = vst [vmem:[#allocation2 + $0x50] sm:$0xf] %v698_v7  ;;  %899 = vmatpush.msra.mxu2 %v862_v61 }
 0x264   : > { %701 = vst [vmem:[#allocation2 + $0x68] sm:$0xf] %v699_v8  ;;  %919 = vmatpush.msra.mxu3 %v863_v16  ;;  %v1957_v62 = vld [vmem:[#allocation2 + $0x30] sm:$0xff] }
 0x265   : > { %681 = vst [vmem:[#allocation2 + $0xb0] sm:$0xf0] %v677_v12  ;;  %900 = vmatpush.msra.mxu2 %v1841_v10  ;;  %v1960_v17 = vld [vmem:[#allocation2 + $0x48] sm:$0xff] }
 0x266   : > { %682 = vst [vmem:[#allocation2] sm:$0xf0] %v678_v13  ;;  %920 = vmatpush.msra.mxu3 %v1844_v11  ;;  %v1363_v13 = vld [vmem:[%s2073_s4 + $0xa] sm:$0x3] }
 0x267   : > { %901 = vmatpush.msra.mxu2 %v1957_v62  ;;  %v934_v20 = vpop.permute.xlu1 %933 }
 0x268   : > { %921 = vmatpush.msra.mxu3 %v1960_v17 }
 0x26a   : > { %v856_v18 = vld [vmem:[#allocation2 + $0x50] sm:$0xff] }
 0x26b   : > { %902 = vmatpush.msra.mxu2 %v856_v18  ;;  %v857_v33 = vld [vmem:[#allocation2 + $0x68] sm:$0xff] }
 0x26c   : > { %922 = vmatpush.msra.mxu3 %v857_v33  ;;  %v1965_v10 = vld [vmem:[#allocation2 + $0xb0] sm:$0xff]  ;;  %v1066_v33 = vperm.slane %v1363_v13, 0 }
 0x26d   : > { %903 = vmatpush.msra.mxu2 %v1849_v14  ;;  %v1968_v11 = vld [vmem:[#allocation2] sm:$0xff] }
 0x26e   : > { %923 = vmatpush.msra.mxu3 %v1852_v15  ;;  %v1362_v14 = vld [vmem:[%s2073_s4 + $0x8] sm:$0x3] }
 0x26f   : > { %904 = vmatpush.msra.mxu2 %v1965_v10  ;;  %v1047_v26 = vperm.slane %v1362_v14, 0  ;;  %v1048_v28 = vperm.slane %v1362_v14, 1 }
 0x270   : > { %924 = vmatpush.msra.mxu3 %v1968_v11  ;;  %1354 = vmatmul.msk.f32.vlgmr.msra.gmra.mxu2 %vm586_vm9, %v851_v19 }
 0x271   : > { %1356 = vmatmul.msk.f32.vlgmr.msra.gmra.mxu3 %vm586_vm9, %v851_v19  ;;  %v1067_v19 = vperm.slane %v1363_v13, 1 }
 0x2f3   : > { %v906_v21 = vpop.f32.mrf.mxu2 }
 0x2f4   : > { %v936_v15 = vmul.f32 %v934_v20, %v906_v21  ;;  %v926_v23 = vpop.f32.mrf.mxu3 }
 0x2f5   : > { %v937_v24 = vmul.f32 %v934_v20, %v926_v23 }
 0x2f6   : > { %v945_v25 = vadd.f32 %v943_v22, %v936_v15 }
 0x2f7   : > { %v946_v27 = vadd.f32 %v943_v22, %v937_v24  ;;  %v1361_v24 = vld [vmem:[%s2073_s4 + $0x6] sm:$0x3] }
 0x2f8   : > { %v947_v29 = vmax.f32 %v945_v25, 0.0 }
 0x2f9   : > { %v948_v30 = vmax.f32 %v946_v27, 0.0 }
 0x2fa   : > { %1099 = vrot.lane.b32.xlu2 %v947_v29, %s1548_s22  ;;  %1124 = vrot.lane.b32.xlu0 %v947_v29, %s1549_s23  ;;  %v1051_v31 = vmul.f32 %v1047_v26, %v947_v29  ;;  %v951_v32 = vrot.slane %v947_v29, 4 }
 0x2fb   : > { %1126 = vrot.lane.b32.xlu1 %v948_v30, %s1549_s23  ;;  %v1052_v34 = vmul.f32 %v1048_v28, %v948_v30  ;;  %v952_v37 = vrot.slane %v948_v30, 4  ;;  %v1032_v28 = vperm.slane %v1361_v24, 1 }
 0x2fc   : > { %1053 = vst [vmem:[#allocation2 + $0x78] sm:$0xf] %v1051_v31 }
 0x2fd   : > { %1054 = vst [vmem:[#allocation2 + $0xb8] sm:$0xf] %v1052_v34 }
 0x2fe   : > { %955 = vst [vmem:[%s1865_s21] sm:$0xf0] %v951_v32 }
 0x2ff   : > { %956 = vst [vmem:[%s1865_s21 + $0x8] sm:$0xf0] %v952_v37 }
 0x302   : > { %1082 = vrot.lane.b32.xlu2 %v948_v30, %s1547_s17  ;;  %1101 = vrot.lane.b32.xlu0 %v948_v30, %s1548_s22 }
 0x303   : > { %1080 = vrot.lane.b32.xlu1 %v947_v29, %s1547_s17 }
 0x30a   : > { %1020 = vrot.lane.b32.xlu2 %v948_v30, %s1545_s15  ;;  %1055 = vrot.lane.b32.xlu0 %v947_v29, %s1546_s16 }
 0x30b   : > { %1057 = vrot.lane.b32.xlu1 %v948_v30, %s1546_s16 }
 0x312   : > { %1004 = vrot.lane.b32.xlu2 %v947_v29, %s1550_s18  ;;  %1023 = vrot.lane.b32.xlu0 %v947_v29, %s1545_s15 }
 0x313   : > { %1001 = vrot.lane.b32.xlu1 %v948_v30, %s1550_s18 }
 0x31a   : > { %957 = vrot.lane.b32.xlu2 %v948_v30, %s1553_s27  ;;  %976 = vrot.lane.b32.xlu0 %v948_v30, %s1551_s24 }
 0x31b   : > { %979 = vrot.lane.b32.xlu1 %v947_v29, %s1551_s24 }
 0x322   : > { %1235 = vperm.xlu2 %1441, %v1372_v38   ;;  %960 = vrot.lane.b32.xlu0 %v947_v29, %s1553_s27 }
 0x323   : > { %1226 = vperm.xlu1 %1440, %v1371_v39  }
 0x354   : > { %v1100_v40 = vpop.permute.xlu2 %1099 }
 0x35c   : > { %v1083_v55 = vpop.permute.xlu2 %1082 }
 0x364   : > { %v1021_v18 = vpop.permute.xlu2 %1020 }
 0x36c   : > { %v1125_v44 = vpop.permute.xlu0 %1124  ;;  %v1005_v37 = vpop.permute.xlu2 %1004 }
 0x36d   : > { %v1127_v45 = vpop.permute.xlu1 %1126 }
 0x36e   : > { %v1128_v46 = vsel %vm536_vm5, %v1125_v44, %v1127_v45  ;;  %v1132_v47 = vsel %vm536_vm5, %v1127_v45, %v1125_v44 }
 0x36f   : > { %v1139_v50 = vmul.f32 %v1135_v42, %v1128_v46  ;;  %v1140_v52 = vmul.f32 %v1136_v43, %v1132_v47 }
 0x371   : > { %1141 = vst [vmem:[#allocation2 + $0xc8] sm:$0xf] %v1139_v50 }
 0x372   : > { %1142 = vst [vmem:[#allocation2 + $0x70] sm:$0xf] %v1140_v52 }
 0x374   : > { %v1102_v59 = vpop.permute.xlu0 %1101 }
 0x375   : > { %v1081_v60 = vpop.permute.xlu1 %1080  ;;  %v1103_v63 = vsel %vm502_vm4, %v1100_v40, %v1102_v59  ;;  %v1107_v0 = vsel %vm502_vm4, %v1102_v59, %v1100_v40  ;;  %v1160_v59 = vld [vmem:[#allocation2 + $0xb8] sm:$0xff] }
 0x376   : > { %v1084_v1 = vsel %vm474_vm3, %v1081_v60, %v1083_v55  ;;  %v1088_v2 = vsel %vm474_vm3, %v1083_v55, %v1081_v60  ;;  %v1114_v3 = vmul.f32 %v1110_v56, %v1103_v63  ;;  %v1115_v5 = vmul.f32 %v1111_v51, %v1107_v0 }
 0x377   : > { %v1095_v6 = vmul.f32 %v1091_v57, %v1084_v1  ;;  %v1096_v7 = vmul.f32 %v1092_v58, %v1088_v2  ;;  %v987_v56 = vperm.slane %v1359_v53, 0  ;;  %v988_v51 = vperm.slane %v1359_v53, 1  ;;  %v966_v1 = vld [vmem:[%s2073_s4] sm:$0x3] }
 0x378   : > { %v1118_v8 = vrot.slane %v1114_v3, 4  ;;  %v1119_v61 = vrot.slane %v1115_v5, 4  ;;  %v1171_v12 = vld [vmem:[#allocation2 + $0xc8] sm:$0xf] }
 0x379   : > { %1097 = vst [vmem:[#allocation2 + $0xd0] sm:$0xf] %v1095_v6  ;;  %1367 = vmatpush.msk.msrb.mxu0 %vm421_vm0, %v1171_v12  ;;  %v1172_v16 = vld [vmem:[#allocation2 + $0x70] sm:$0xf]  ;;  %v968_v6 = vperm.slane %v966_v1, 0 }
 0x37a   : > { %1098 = vst [vmem:[#allocation2 + $0xa8] sm:$0xf] %v1096_v7  ;;  %1369 = vmatpush.msk.msrb.mxu1 %vm421_vm0, %v1172_v16  ;;  %v969_v7 = vperm.slane %v966_v1, 1 }
 0x37b   : > { %1122 = vst [vmem:[#allocation2 + $0x98] sm:$0xf0] %v1118_v8  ;;  %1185 = vmatpush.msrb.mxu0 %v1921_v35  ;;  %v1360_v35 = vld [vmem:[%s2073_s4 + $0x4] sm:$0x3] }
 0x37c   : > { %1123 = vst [vmem:[#allocation2 + $0xa0] sm:$0xf0] %v1119_v61  ;;  %1205 = vmatpush.msrb.mxu1 %v1924_v36  ;;  %v1056_v20 = vpop.permute.xlu0 %1055  ;;  %v1031_v36 = vperm.slane %v1361_v24, 0  ;;  %v1012_v30 = vperm.slane %v1360_v35, 0  ;;  %v1013_v31 = vperm.slane %v1360_v35, 1  ;;  %v958_v61 = vpop.permute.xlu2 %957 }
 0x37d   : > { %v1058_v21 = vpop.permute.xlu1 %1057 }
 0x37e   : > { %v1059_v22 = vsel %vm440_vm2, %v1056_v20, %v1058_v21  ;;  %v1063_v14 = vsel %vm440_vm2, %v1058_v21, %v1056_v20 }
 0x37f   : > { %v1070_v15 = vmul.f32 %v1066_v33, %v1059_v22  ;;  %v1071_v23 = vmul.f32 %v1067_v19, %v1063_v14  ;;  %v1144_v14 = vld [vmem:[#allocation5 + $0x8] sm:$0xf] }
 0x380   : > { %v1165_v32 = vld [vmem:[#allocation2 + $0xd0] sm:$0xff] }
 0x381   : > { %v1074_v25 = vrot.slane %v1070_v15, 4  ;;  %v1075_v26 = vrot.slane %v1071_v23, 4  ;;  %v1166_v39 = vld [vmem:[#allocation2 + $0xa8] sm:$0xff] }
 0x382   : > { %v1167_v27 = vld [vmem:[#allocation2 + $0x98] sm:$0xff] }
 0x383   : > { %1078 = vst [vmem:[#allocation2 + $0x40] sm:$0xf0] %v1074_v25  ;;  %1186 = vmatpush.msrb.mxu0 %v1167_v27  ;;  %v1168_v29 = vld [vmem:[#allocation2 + $0xa0] sm:$0xff] }
 0x384   : > { %1079 = vst [vmem:[#allocation2 + $0x28] sm:$0xf0] %v1075_v26  ;;  %1206 = vmatpush.msrb.mxu1 %v1168_v29  ;;  %v1024_v34 = vpop.permute.xlu0 %1023  ;;  %v1236_v24 = vpop.permute.xlu2 %1235 }
 0x385   : > { %v1002_v38 = vpop.permute.xlu1 %1001  ;;  %1187 = vmatpush.msrb.mxu0 %v1165_v32  ;;  %v1025_v40 = vsel %vm393_vm1, %v1024_v34, %v1021_v18  ;;  %v1028_v41 = vsel %vm393_vm1, %v1021_v18, %v1024_v34 }
 0x386   : > { %v1006_v42 = vsel %vm365_vm6, %v1005_v37, %v1002_v38  ;;  %v1009_v43 = vsel %vm365_vm6, %v1002_v38, %v1005_v37  ;;  %1207 = vmatpush.msrb.mxu1 %v1166_v39  ;;  %v1035_v44 = vmul.f32 %v1031_v36, %v1028_v41  ;;  %v1036_v45 = vmul.f32 %v1032_v28, %v1025_v40 }
 0x387   : > { %v1016_v46 = vmul.f32 %v1012_v30, %v1009_v43  ;;  %v1017_v47 = vmul.f32 %v1013_v31, %v1006_v42  ;;  %1188 = vmatpush.msrb.mxu0 %v1934_v49  ;;  %v1159_v49 = vld [vmem:[#allocation2 + $0x78] sm:$0xff] }
 0x388   : > { %v1039_v50 = vrot.slane %v1035_v44, 4  ;;  %v1040_v52 = vrot.slane %v1036_v45, 4  ;;  %1208 = vmatpush.msrb.mxu1 %v1940_v54 }
 0x389   : > { %1018 = vst [vmem:[#allocation2 + $0x80] sm:$0xf] %v1016_v46 }
 0x38a   : > { %1019 = vst [vmem:[#allocation2 + $0x88] sm:$0xf] %v1017_v47  ;;  %v1161_v48 = vld [vmem:[#allocation2 + $0x40] sm:$0xff] }
 0x38b   : > { %1043 = vst [vmem:[#allocation2 + $0x8] sm:$0xf0] %v1039_v50  ;;  %1189 = vmatpush.msrb.mxu0 %v1161_v48  ;;  %v1162_v55 = vld [vmem:[#allocation2 + $0x28] sm:$0xff] }
 0x38c   : > { %1044 = vst [vmem:[#allocation2 + $0x58] sm:$0xf0] %v1040_v52  ;;  %1209 = vmatpush.msrb.mxu1 %v1162_v55  ;;  %v977_v57 = vpop.permute.xlu0 %976 }
 0x38d   : > { %v980_v58 = vpop.permute.xlu1 %979  ;;  %1190 = vmatpush.msrb.mxu0 %v1159_v49 }
 0x38e   : > { %1210 = vmatpush.msrb.mxu1 %v1160_v59  ;;  %v981_v54 = vsel %vm331_vm7, %v980_v58, %v977_v57  ;;  %v984_v60 = vsel %vm331_vm7, %v977_v57, %v980_v58 }
 0x38f   : > { %v991_v63 = vmul.f32 %v987_v56, %v984_v60  ;;  %v992_v0 = vmul.f32 %v988_v51, %v981_v54  ;;  %1191 = vmatpush.msrb.mxu0 %v1949_v4 }
 0x390   : > { %1211 = vmatpush.msrb.mxu1 %v1952_v9  ;;  %v1153_v13 = vld [vmem:[#allocation2 + $0x80] sm:$0xff] }
 0x391   : > { %v995_v2 = vrot.slane %v991_v63, 4  ;;  %v996_v3 = vrot.slane %v992_v0, 4  ;;  %v1154_v4 = vld [vmem:[#allocation2 + $0x88] sm:$0xff] }
 0x392   : > { %v1155_v5 = vld [vmem:[#allocation2 + $0x8] sm:$0xff] }
 0x393   : > { %999 = vst [vmem:[#allocation2 + $0x50] sm:$0xf0] %v995_v2  ;;  %1192 = vmatpush.msrb.mxu0 %v1155_v5  ;;  %v1156_v8 = vld [vmem:[#allocation2 + $0x58] sm:$0xff] }
 0x394   : > { %1000 = vst [vmem:[#allocation2 + $0x68] sm:$0xf0] %v996_v3  ;;  %1212 = vmatpush.msrb.mxu1 %v1156_v8  ;;  %v961_v12 = vpop.permute.xlu0 %960 }
 0x395   : > { %v962_v16 = vsel %vm304_vm8, %v961_v12, %v958_v61  ;;  %v965_v18 = vsel %vm304_vm8, %v958_v61, %v961_v12  ;;  %1193 = vmatpush.msrb.mxu0 %v1153_v13 }
 0x396   : > { %1213 = vmatpush.msrb.mxu1 %v1154_v4  ;;  %v972_v9 = vmul.f32 %v968_v6, %v965_v18  ;;  %v973_v33 = vmul.f32 %v969_v7, %v962_v16 }
 0x397   : > { %1194 = vmatpush.msrb.mxu0 %v1957_v62  ;;  %v1227_v62 = vpop.permute.xlu1 %1226 }
 0x398   : > { %974 = vst [vmem:[#allocation2 + $0xd8] sm:$0xf] %v972_v9  ;;  %1214 = vmatpush.msrb.mxu1 %v1960_v17 }
 0x399   : > { %975 = vst [vmem:[#allocation2 + $0x18] sm:$0xf] %v973_v33 }
 0x39a   : > { %v1149_v19 = vld [vmem:[#allocation2 + $0x50] sm:$0xff] }
 0x39b   : > { %1195 = vmatpush.msrb.mxu0 %v1149_v19  ;;  %v1150_v20 = vld [vmem:[#allocation2 + $0x68] sm:$0xff] }
 0x39c   : > { %1215 = vmatpush.msrb.mxu1 %v1150_v20 }
 0x39f   : > { %v1147_v21 = vld [vmem:[#allocation2 + $0xd8] sm:$0xff] }
 0x3a0   : > { %1196 = vmatpush.msrb.mxu0 %v1147_v21  ;;  %v1148_v22 = vld [vmem:[#allocation2 + $0x18] sm:$0xff] }
 0x3a1   : > { %1216 = vmatpush.msrb.mxu1 %v1148_v22 }
 0x3a2   : > { %1197 = vmatpush.msrb.mxu0 %v1965_v10 }
 0x3a3   : > { %1217 = vmatpush.msrb.mxu1 %v1968_v11  ;;  %1368 = vmatmul.msk.f32.vlgmr.msrb.gmra.mxu0 %vm586_vm9, %v1144_v14 }
 0x3a4   : > { %1370 = vmatmul.msk.f32.vlgmr.msrb.gmra.mxu1 %vm586_vm9, %v1144_v14 }
 0x420   : > { %v1199_v17 = vpop.f32.mrf.mxu0 }
 0x421   : > { %v1229_v15 = vmul.f32 %v1227_v62, %v1199_v17  ;;  %v1219_v23 = vpop.f32.mrf.mxu1 }
 0x422   : > { %v1230_v35 = vmul.f32 %v1227_v62, %v1219_v23 }
 0x423   : > { %v1238_v25 = vadd.f32 %v1236_v24, %v1229_v15 }
 0x424   : > { %v1239_v26 = vadd.f32 %v1236_v24, %v1230_v35 }
 0x425   : > { %v1240_v27 = vmax.f32 %v1238_v25, 0.0 }
 0x426   : > { %v1241_v36 = vmax.f32 %v1239_v26, 0.0 }
 0x427   : > { %1242 = vst [vmem:[%s1865_s21 + $0x10] sm:$0xf] %v1240_v27 }
 0x428   : > { %1243 = vst [vmem:[%s1865_s21 + $0x18] sm:$0xf] %v1241_v36 }
 0x429 PF: > { %p16_p3 = scmp.ge.s32.totalorder %s1621_s6, 4   ;;  %s2078_s18 = smov %s1532_s19 }
 0x42a   : > { %s2079_s19 = smov %s1536_s20  ;;  %s2080_s20 = smov %s1631_s9 }
 0x42b   : > { %s2081_s21 = smov %s1621_s6  ;;  %18 = sbr.rel (!%p16_p3) target bundleno = 4 (0x4), region = 98 }
 0x430   :  { %1265 = vsyncpa [#allocation4], 1 }
 0x431   :  { %1267 = vsyncpa [#allocation4 + $0x1], 1 }
 0x432   :  { %1268 = vsyncpa [#allocation6], 1 }

</bundles_post_ra>
